<compile_context>
chip_gen: v7x
topology: tpu7x:2x2x1
jax: 0.10.0
libtpu: 0.0.40
codegen_flags: <defaults>
</compile_context>

<pallas_src>
import jax
import jax.numpy as jnp
from jax.experimental import pallas as pl
from jax.experimental.pallas import tpu as pltpu


def _round_up(x, m):
    return ((x + m - 1) // m) * m


def _bilstm_kernel(emb_ref, len_ref, wih_ref, bih_ref, whh_ref, wc_ref, bc_ref,
                   logits_ref, ginf_ref, ginb_ref, h_ref):
    """Fused BiLSTM recurrence + token classifier for one batch tile.

    emb_ref    : (T, BT, E)   bf16 embeddings (time-major)
    len_ref    : (BT, 1)      int32 per-sample valid lengths
    wih_ref    : (E, 8H)      bf16 input->gate weights, [fwd | bwd] along lanes
    bih_ref    : (1, 8H)      f32 folded biases (b_ih + b_hh), [fwd | bwd]
    whh_ref    : (H, 8H)      bf16 hidden->gate weights, [fwd | bwd] along lanes
    wc_ref     : (2H, Op)     bf16 classifier weight (lane-padded)
    bc_ref     : (1, Op)      f32 classifier bias (lane-padded)
    logits_ref : (T, BT, Op)  f32 output logits (time-major, lane-padded)
    ginf_ref   : (T, BT, 4H)  f32 scratch: fwd input-gate precompute
    ginb_ref   : (T, BT, 4H)  f32 scratch: bwd input-gate precompute
    h_ref      : (T, BT, 2H)  f32 scratch: merged [fwd | bwd] hidden sequence
    """
    T, BT, E = emb_ref.shape
    H = whh_ref.shape[0]
    G = 4 * H
    Op = logits_ref.shape[2]

    # ---- Stage 1: hoisted input->gate projection, both directions at once ----
    # One (T*BT, E) x (E, 8H) MXU matmul with biases folded in; the serial loop
    # below only does the recurrent h @ W_hh matmul per step.
    emb_flat = emb_ref[...].reshape(T * BT, E)
    gin = jnp.dot(emb_flat, wih_ref[...],
                  preferred_element_type=jnp.float32) + bih_ref[...]
    ginf_ref[...] = gin[:, 0:G].reshape(T, BT, G)
    ginb_ref[...] = gin[:, G:2 * G].reshape(T, BT, G)

    # Loop-invariant loads hoisted out of the recurrence.
    whh = whh_ref[...]            # (H, 8H) bf16
    lens = len_ref[...]           # (BT, 1) int32

    # ---- Stage 2: fwd + bwd recurrence fused onto a row-stacked state ----
    # Rows [0:BT] carry the forward direction (time t), rows [BT:2BT] the
    # backward direction (time T-1-t): ONE (2BT,H)x(H,8H) recurrent matmul and
    # one set of transcendental / VPU ops per step instead of two.
    def step(t, carry):
        h_fb, c_fb = carry                                         # (2BT, H) f32
        tb = T - 1 - t

        g_rec = jnp.dot(h_fb.astype(jnp.bfloat16), whh,
                        preferred_element_type=jnp.float32)        # (2BT, 8H)
        # Quadrants are sublane/lane-tile aligned (BT mult of 8, G = 128).
        gates = jnp.concatenate(
            [ginf_ref[t] + g_rec[:BT, 0:G],
             ginb_ref[tb] + g_rec[BT:, G:2 * G]], axis=0)          # (2BT, 4H)

        # Transcendentals once over the full 4H-lane gate tile, then cheap
        # static slices (PyTorch gate order i, f, g, o).
        sg = jax.nn.sigmoid(gates)
        th = jnp.tanh(gates)
        i = sg[:, 0 * H:1 * H]
        f = sg[:, 1 * H:2 * H]
        g = th[:, 2 * H:3 * H]
        o = sg[:, 3 * H:4 * H]
        c_new = f * c_fb + i * g
        h_new = o * jnp.tanh(c_new)

        # pack_padded_sequence semantics from per-sample lengths (no HBM mask):
        # state advances only while t < len; outputs are zero past len.
        # mf is exactly 0/1 (lengths are integers), pure arithmetic mask.
        mf = jnp.concatenate(
            [jnp.clip((lens - t).astype(jnp.float32), 0.0, 1.0),
             jnp.clip((lens - tb).astype(jnp.float32), 0.0, 1.0)], axis=0)
        one_m = 1.0 - mf
        hm = mf * h_new                                            # masked output
        h_out = hm + one_m * h_fb
        c_out = mf * c_new + one_m * c_fb

        h_ref[t, :, 0:H] = hm[:BT]           # fwd output at time t
        h_ref[tb, :, H:2 * H] = hm[BT:]      # bwd output at time T-1-t
        return h_out, c_out

    zeros = jnp.zeros((2 * BT, H), jnp.float32)
    jax.lax.fori_loop(0, T, step, (zeros, zeros),
                      unroll=(T if T <= 16 else 4))

    # ---- Stage 3: classifier as ONE (T*BT, 2H) x (2H, Op) matmul ----
    h_flat = h_ref[...].reshape(T * BT, 2 * H).astype(jnp.bfloat16)
    logits = jnp.dot(h_flat, wc_ref[...],
                     preferred_element_type=jnp.float32) + bc_ref[...]
    logits_ref[...] = logits.reshape(T, BT, Op)


def _vmem_limit_bytes():
    """Scoped-VMEM limit: ~3/4 of physical, capped at 100 MiB."""
    try:
        cap = getattr(pltpu.get_tpu_info(), "vmem_capacity_bytes", None)
        if cap:
            return int(min(100 * 1024 * 1024, (cap * 3) // 4))
    except Exception:
        pass
    return 48 * 1024 * 1024


def bilstm_forward(input_ids, attention_mask, params, *, batch_tile=128):
    """Batch-first wrapper matching the PyTorch forward (labels=None path)."""
    emb_table = params["embedding"]                      # (V, E) f32
    B, T = input_ids.shape
    E = emb_table.shape[1]
    H = params["whh_f"].shape[0]
    O = params["wc"].shape[1]

    # Batch tile: as large as possible (the serial T-recurrence is re-run once
    # per tile), capped at 128 so a tile matches every generation's MXU height;
    # clamped/8-aligned for tiny batches.
    BT = _round_up(min(batch_tile, max(B, 1)), 8)
    Bp = _round_up(B, BT)
    Op = _round_up(O, 128)                               # lane-dense logits store

    # Embedding gather directly in time-major (no (B,T,E) HBM transpose).
    ids_tb = jnp.pad(jnp.transpose(input_ids), ((0, 0), (0, Bp - B)))        # (T, Bp)
    emb_tbe = jnp.take(emb_table, ids_tb, axis=0).astype(jnp.bfloat16)       # (T, Bp, E)

    # Per-sample lengths only — the (T,B,H) broadcast mask input is gone.
    lens = attention_mask.astype(jnp.int32).sum(axis=1)                      # (B,)
    lens_p = jnp.pad(lens, (0, Bp - B)).reshape(Bp, 1)                       # (Bp, 1)

    # Weights: pre-transposed, fwd|bwd packed along lanes; bf16 MXU operands.
    wih_both = jnp.concatenate([params["wih_f"], params["wih_b"]],
                               axis=1).astype(jnp.bfloat16)                  # (E, 8H)
    bih_both = jnp.concatenate([params["b_f"], params["b_b"]], axis=1)       # (1, 8H)
    whh_both = jnp.concatenate([params["whh_f"], params["whh_b"]],
                               axis=1).astype(jnp.bfloat16)                  # (H, 8H)
    wc_pad = jnp.pad(params["wc"], ((0, 0), (0, Op - O))).astype(jnp.bfloat16)
    bc_pad = jnp.pad(params["bc"], ((0, 0), (0, Op - O)))                    # (1, Op)

    grid = (Bp // BT,)
    # TODO(synk): at production T, tile the T axis for stages 1 and 3 (both are
    # T-parallel) so gin/hidden scratch fits v7x's 64 MiB VMEM, and use
    # CORE_PARALLEL (or an explicit 2-core core_map) on the batch axis so both
    # v7x TensorCores take different batch tiles.
    logits_pad = pl.pallas_call(
        _bilstm_kernel,
        out_shape=jax.ShapeDtypeStruct((T, Bp, Op), jnp.float32),
        grid=grid,
        in_specs=[
            pl.BlockSpec((T, BT, E), lambda i: (0, i, 0)),        # embeddings
            pl.BlockSpec((BT, 1), lambda i: (i, 0)),              # lengths
            pl.BlockSpec((E, 8 * H), lambda i: (0, 0)),           # W_ih (both dirs)
            pl.BlockSpec((1, 8 * H), lambda i: (0, 0)),           # biases (both dirs)
            pl.BlockSpec((H, 8 * H), lambda i: (0, 0)),           # W_hh (both dirs)
            pl.BlockSpec((2 * H, Op), lambda i: (0, 0)),          # classifier W
            pl.BlockSpec((1, Op), lambda i: (0, 0)),              # classifier b
        ],
        out_specs=pl.BlockSpec((T, BT, Op), lambda i: (0, i, 0)),
        scratch_shapes=[
            pltpu.VMEM((T, BT, 4 * H), jnp.float32),   # fwd input-gate precompute
            pltpu.VMEM((T, BT, 4 * H), jnp.float32),   # bwd input-gate precompute
            pltpu.VMEM((T, BT, 2 * H), jnp.float32),   # merged hidden sequence
        ],
        compiler_params=pltpu.CompilerParams(
            dimension_semantics=("parallel",),
            vmem_limit_bytes=_vmem_limit_bytes(),
        ),
    )(emb_tbe, lens_p, wih_both, bih_both, whh_both, wc_pad, bc_pad)

    # Slice off batch/lane padding; transpose only the small logits tensor.
    return jnp.transpose(logits_pad[:, :B, :O], (1, 0, 2))                   # (B, T, O)


def init_params(key, vocab_size, embedding_dim, hidden_dim, out_size):
    """Deterministic parameter init (PyTorch-style uniform ranges)."""
    ks = jax.random.split(key, 12)
    E, H, O = embedding_dim, hidden_dim, out_size
    lstm_bound = 1.0 / jnp.sqrt(jnp.float32(H))
    cls_bound = 1.0 / jnp.sqrt(jnp.float32(2 * H))

    def u(k, shape, bound):
        return jax.random.uniform(k, shape, jnp.float32, -bound, bound)

    return {
        # nn.Embedding default init ~ N(0, 1)
        "embedding": jax.random.normal(ks[0], (vocab_size, E), jnp.float32),
        # LSTM weights, pre-transposed for x @ W form; gate order i,f,g,o.
        "wih_f": u(ks[1], (E, 4 * H), lstm_bound),
        "whh_f": u(ks[2], (H, 4 * H), lstm_bound),
        "b_f":   u(ks[3], (1, 4 * H), lstm_bound) + u(ks[4], (1, 4 * H), lstm_bound),
        "wih_b": u(ks[5], (E, 4 * H), lstm_bound),
        "whh_b": u(ks[6], (H, 4 * H), lstm_bound),
        "b_b":   u(ks[7], (1, 4 * H), lstm_bound) + u(ks[8], (1, 4 * H), lstm_bound),
        # classifier Linear(2H, O), pre-transposed
        "wc": u(ks[9], (2 * H, O), cls_bound),
        "bc": u(ks[10], (1, O), cls_bound),
    }


def _reference_forward(input_ids, attention_mask, params):
    """Pure-JAX f32 reference (pack/pad semantics for right-padded inputs)."""
    emb = params["embedding"][input_ids]                 # (B, T, E)
    B, T, _ = emb.shape
    H = params["whh_f"].shape[0]
    mask = attention_mask.astype(jnp.float32)            # (B, T)

    def run(wih, whh, b, xs, ms):                        # xs: (T,B,E), ms: (T,B)
        def step(carry, xm):
            h, c = carry
            x, m = xm
            gates = x @ wih + h @ whh + b
            i = jax.nn.sigmoid(gates[:, 0 * H:1 * H])
            f = jax.nn.sigmoid(gates[:, 1 * H:2 * H])
            g = jnp.tanh(gates[:, 2 * H:3 * H])
            o = jax.nn.sigmoid(gates[:, 3 * H:4 * H])
            c_new = f * c + i * g
            h_new = o * jnp.tanh(c_new)
            m1 = m[:, None]
            return (m1 * h_new + (1 - m1) * h, m1 * c_new + (1 - m1) * c), h_new * m1
        init = (jnp.zeros((B, H), jnp.float32), jnp.zeros((B, H), jnp.float32))
        _, outs = jax.lax.scan(step, init, (xs, ms))
        return outs                                       # (T, B, H)

    xs = jnp.transpose(emb, (1, 0, 2))
    ms = jnp.transpose(mask)
    out_f = run(params["wih_f"], params["whh_f"], params["b_f"][0], xs, ms)
    out_b = run(params["wih_b"], params["whh_b"], params["b_b"][0],
                xs[::-1], ms[::-1])[::-1]
    out = jnp.concatenate([out_f, out_b], axis=-1)        # (T, B, 2H)
    logits = out @ params["wc"] + params["bc"][0]
    return jnp.transpose(logits, (1, 0, 2))               # (B, T, O)


if __name__ == "__main__":
    # Small shapes consistent with the module defaults (hidden_dim=32).
    VOCAB, E, H, O = 50, 16, 32, 5
    key = jax.random.PRNGKey(0)
    k_par, k_ids, k_ids2 = jax.random.split(key, 3)
    params = init_params(k_par, VOCAB, E, H, O)

    # --- Test 1: B=2, T=8, single batch tile -------------------------------
    B, T = 2, 8
    input_ids = jax.random.randint(k_ids, (B, T), 0, VOCAB, dtype=jnp.int32)
    lengths = jnp.array([8, 5], dtype=jnp.int32)          # right-padded mask
    attention_mask = (jnp.arange(T)[None, :] < lengths[:, None]).astype(jnp.int32)

    logits = bilstm_forward(input_ids, attention_mask, params)
    logits = jax.block_until_ready(logits)
    assert logits.shape == (B, T, O)
    assert bool(jnp.all(jnp.isfinite(logits)))
    ref = _reference_forward(input_ids, attention_mask, params)
    max_err = float(jnp.max(jnp.abs(logits - ref)))
    assert max_err < 5e-2, f"mismatch vs reference (test 1): max abs err = {max_err}"

    # --- Test 2: B=10, T=12, batch padding + multi-tile grid ---------------
    B2, T2 = 10, 12
    input_ids2 = jax.random.randint(k_ids2, (B2, T2), 0, VOCAB, dtype=jnp.int32)
    lengths2 = jnp.array([12, 3, 7, 12, 1, 5, 9, 2, 11, 6], dtype=jnp.int32)
    attention_mask2 = (jnp.arange(T2)[None, :] < lengths2[:, None]).astype(jnp.int32)

    logits2 = bilstm_forward(input_ids2, attention_mask2, params, batch_tile=8)
    logits2 = jax.block_until_ready(logits2)
    assert logits2.shape == (B2, T2, O)
    assert bool(jnp.all(jnp.isfinite(logits2)))
    ref2 = _reference_forward(input_ids2, attention_mask2, params)
    max_err2 = float(jnp.max(jnp.abs(logits2 - ref2)))
    assert max_err2 < 5e-2, f"mismatch vs reference (test 2): max abs err = {max_err2}"

    print("KERNEL_OK")
</pallas_src>

<mosaic_0001>
module attributes {stable_mosaic.version = 11 : i64} {
  func.func @_bilstm_kernel(%arg0: i32, %arg1: memref<8x8x16xbf16, #tpu.memory_space<vmem>>, %arg2: memref<8x1xi32, #tpu.memory_space<vmem>>, %arg3: memref<16x256xbf16, #tpu.memory_space<vmem>>, %arg4: memref<1x256xf32, #tpu.memory_space<vmem>>, %arg5: memref<32x256xbf16, #tpu.memory_space<vmem>>, %arg6: memref<64x128xbf16, #tpu.memory_space<vmem>>, %arg7: memref<1x128xf32, #tpu.memory_space<vmem>>, %arg8: memref<8x8x128xf32, #tpu.memory_space<vmem>>, %arg9: memref<8x8x128xf32, #tpu.memory_space<vmem>>, %arg10: memref<8x8x128xf32, #tpu.memory_space<vmem>>, %arg11: memref<8x8x64xf32, #tpu.memory_space<vmem>>) attributes {dimension_semantics = [#tpu.dimension_semantics<parallel>], iteration_bounds = array<i64: 1>, scalar_prefetch = 0 : i64, scratch_operands = 3 : i64, tpu.core_type = #tpu.core_type<tc>, window_params = [{transform_indices = @transform_0, window_bounds = array<i64: 8, 8, 16>}, {transform_indices = @transform_1, window_bounds = array<i64: 8, 1>}, {pipeline_mode = #tpu.pipeline_mode<synchronous>, transform_indices = @transform_2, window_bounds = array<i64: 16, 256>}, {pipeline_mode = #tpu.pipeline_mode<synchronous>, transform_indices = @transform_3, window_bounds = array<i64: 1, 256>}, {pipeline_mode = #tpu.pipeline_mode<synchronous>, transform_indices = @transform_4, window_bounds = array<i64: 32, 256>}, {pipeline_mode = #tpu.pipeline_mode<synchronous>, transform_indices = @transform_5, window_bounds = array<i64: 64, 128>}, {pipeline_mode = #tpu.pipeline_mode<synchronous>, transform_indices = @transform_6, window_bounds = array<i64: 1, 128>}, {transform_indices = @transform_7, window_bounds = array<i64: 8, 8, 128>}]} {
    %c0 = arith.constant 0 : index
    %c0_0 = arith.constant 0 : index
    %c0_1 = arith.constant 0 : index
    %0 = vector.load %arg1[%c0, %c0_0, %c0_1] : memref<8x8x16xbf16, #tpu.memory_space<vmem>>, vector<8x8x16xbf16>
    %1 = vector.shape_cast %0 : vector<8x8x16xbf16> to vector<64x16xbf16>
    %c0_2 = arith.constant 0 : index
    %c0_3 = arith.constant 0 : index
    %2 = vector.load %arg3[%c0_2, %c0_3] : memref<16x256xbf16, #tpu.memory_space<vmem>>, vector<16x256xbf16>
    %cst = arith.constant dense<0.000000e+00> : vector<64x256xf32>
    %3 = tpu.matmul %1, %2, %cst {dimension_numbers = #tpu.dot_dimension_numbers<[1], [0], [0], [1], [0, 0, 1, 1], [], []>} : vector<64x16xbf16>, vector<16x256xbf16>, vector<64x256xf32> -> vector<64x256xf32>
    %c0_4 = arith.constant 0 : index
    %c0_5 = arith.constant 0 : index
    %4 = vector.load %arg4[%c0_4, %c0_5] : memref<1x256xf32, #tpu.memory_space<vmem>>, vector<1x256xf32>
    %5 = vector.broadcast %4 : vector<1x256xf32> to vector<64x256xf32>
    %6 = arith.addf %3, %5 : vector<64x256xf32>
    %7 = vector.extract_strided_slice %6 {offsets = [0, 0], sizes = [64, 128], strides = [1, 1]} : vector<64x256xf32> to vector<64x128xf32>
    %8 = vector.shape_cast %7 : vector<64x128xf32> to vector<8x8x128xf32>
    %c0_6 = arith.constant 0 : index
    %c0_7 = arith.constant 0 : index
    %c0_8 = arith.constant 0 : index
    %9 = vector.load %arg9[%c0_6, %c0_7, %c0_8] : memref<8x8x128xf32, #tpu.memory_space<vmem>>, vector<8x8x128xf32>
    tpu.vector_store %arg9[%c0_6, %c0_7, %c0_8], %8 {strides = array<i32>} : memref<8x8x128xf32, #tpu.memory_space<vmem>>, vector<8x8x128xf32>,
    %10 = vector.extract_strided_slice %6 {offsets = [0, 128], sizes = [64, 128], strides = [1, 1]} : vector<64x256xf32> to vector<64x128xf32>
    %11 = vector.shape_cast %10 : vector<64x128xf32> to vector<8x8x128xf32>
    %c0_9 = arith.constant 0 : index
    %c0_10 = arith.constant 0 : index
    %c0_11 = arith.constant 0 : index
    %12 = vector.load %arg10[%c0_9, %c0_10, %c0_11] : memref<8x8x128xf32, #tpu.memory_space<vmem>>, vector<8x8x128xf32>
    tpu.vector_store %arg10[%c0_9, %c0_10, %c0_11], %11 {strides = array<i32>} : memref<8x8x128xf32, #tpu.memory_space<vmem>>, vector<8x8x128xf32>,
    %c0_12 = arith.constant 0 : index
    %c0_13 = arith.constant 0 : index
    %13 = vector.load %arg5[%c0_12, %c0_13] : memref<32x256xbf16, #tpu.memory_space<vmem>>, vector<32x256xbf16>
    %c0_14 = arith.constant 0 : index
    %c0_15 = arith.constant 0 : index
    %14 = vector.load %arg2[%c0_14, %c0_15] : memref<8x1xi32, #tpu.memory_space<vmem>>, vector<8x1xi32>
    %cst_16 = arith.constant 0.000000e+00 : f32
    %15 = vector.broadcast %cst_16 : f32 to vector<16x32xf32>
    %c0_i32 = arith.constant 0 : i32
    %c7_i32 = arith.constant 7 : i32
    %16 = arith.subi %c7_i32, %c0_i32 : i32
    %17 = arith.truncf %15 : vector<16x32xf32> to vector<16x32xbf16>
    %cst_17 = arith.constant dense<0.000000e+00> : vector<16x256xf32>
    %18 = tpu.matmul %17, %13, %cst_17 {dimension_numbers = #tpu.dot_dimension_numbers<[1], [0], [0], [1], [0, 0, 1, 1], [], []>} : vector<16x32xbf16>, vector<32x256xbf16>, vector<16x256xf32> -> vector<16x256xf32>
    %19 = arith.index_cast %c0_i32 : i32 to index
    %c0_18 = arith.constant 0 : index
    %c0_19 = arith.constant 0 : index
    %20 = vector.load %arg9[%19, %c0_18, %c0_19] : memref<8x8x128xf32, #tpu.memory_space<vmem>>, vector<1x8x128xf32>
    %21 = vector.shape_cast %20 : vector<1x8x128xf32> to vector<8x128xf32>
    %22 = vector.extract_strided_slice %18 {offsets = [0, 0], sizes = [8, 128], strides = [1, 1]} : vector<16x256xf32> to vector<8x128xf32>
    %23 = arith.addf %21, %22 : vector<8x128xf32>
    %24 = arith.index_cast %16 : i32 to index
    %c0_20 = arith.constant 0 : index
    %c0_21 = arith.constant 0 : index
    %25 = vector.load %arg10[%24, %c0_20, %c0_21] : memref<8x8x128xf32, #tpu.memory_space<vmem>>, vector<1x8x128xf32>
    %26 = vector.shape_cast %25 : vector<1x8x128xf32> to vector<8x128xf32>
    %27 = vector.extract_strided_slice %18 {offsets = [8, 128], sizes = [8, 128], strides = [1, 1]} : vector<16x256xf32> to vector<8x128xf32>
    %28 = arith.addf %26, %27 : vector<8x128xf32>
    %29 = tpu.concatenate %23, %28 in 0 : vector<8x128xf32>, vector<8x128xf32> -> vector<16x128xf32>
    %30 = arith.negf %29 : vector<16x128xf32>
    %31 = math.exp %30 : vector<16x128xf32>
    %cst_22 = arith.constant 1.000000e+00 : f32
    %32 = vector.broadcast %cst_22 : f32 to vector<16x128xf32>
    %33 = arith.addf %32, %31 : vector<16x128xf32>
    %34 = arith.divf %32, %33 : vector<16x128xf32>
    %35 = math.tanh %29 : vector<16x128xf32>
    %36 = vector.extract_strided_slice %34 {offsets = [0, 0], sizes = [16, 32], strides = [1, 1]} : vector<16x128xf32> to vector<16x32xf32>
    %37 = vector.extract_strided_slice %34 {offsets = [0, 32], sizes = [16, 32], strides = [1, 1]} : vector<16x128xf32> to vector<16x32xf32>
    %38 = vector.extract_strided_slice %35 {offsets = [0, 64], sizes = [16, 32], strides = [1, 1]} : vector<16x128xf32> to vector<16x32xf32>
    %39 = vector.extract_strided_slice %34 {offsets = [0, 96], sizes = [16, 32], strides = [1, 1]} : vector<16x128xf32> to vector<16x32xf32>
    %40 = arith.mulf %37, %15 : vector<16x32xf32>
    %41 = arith.mulf %36, %38 : vector<16x32xf32>
    %42 = arith.addf %40, %41 : vector<16x32xf32>
    %43 = math.tanh %42 : vector<16x32xf32>
    %44 = arith.mulf %39, %43 : vector<16x32xf32>
    %45 = vector.broadcast %c0_i32 : i32 to vector<8x1xi32>
    %46 = arith.subi %14, %45 : vector<8x1xi32>
    %47 = arith.sitofp %46 : vector<8x1xi32> to vector<8x1xf32>
    %cst_23 = arith.constant 0.000000e+00 : f32
    %cst_24 = arith.constant 1.000000e+00 : f32
    %48 = vector.broadcast %cst_23 : f32 to vector<8x1xf32>
    %49 = arith.maximumf %48, %47 : vector<8x1xf32>
    %50 = vector.broadcast %cst_24 : f32 to vector<8x1xf32>
    %51 = arith.minimumf %50, %49 : vector<8x1xf32>
    %52 = vector.broadcast %16 : i32 to vector<8x1xi32>
    %53 = arith.subi %14, %52 : vector<8x1xi32>
    %54 = arith.sitofp %53 : vector<8x1xi32> to vector<8x1xf32>
    %cst_25 = arith.constant 0.000000e+00 : f32
    %cst_26 = arith.constant 1.000000e+00 : f32
    %55 = vector.broadcast %cst_25 : f32 to vector<8x1xf32>
    %56 = arith.maximumf %55, %54 : vector<8x1xf32>
    %57 = vector.broadcast %cst_26 : f32 to vector<8x1xf32>
    %58 = arith.minimumf %57, %56 : vector<8x1xf32>
    %59 = tpu.concatenate %51, %58 in 0 : vector<8x1xf32>, vector<8x1xf32> -> vector<16x1xf32>
    %cst_27 = arith.constant 1.000000e+00 : f32
    %60 = vector.broadcast %cst_27 : f32 to vector<16x1xf32>
    %61 = arith.subf %60, %59 : vector<16x1xf32>
    %62 = vector.broadcast %59 : vector<16x1xf32> to vector<16x32xf32>
    %63 = arith.mulf %62, %44 : vector<16x32xf32>
    %64 = vector.broadcast %61 : vector<16x1xf32> to vector<16x32xf32>
    %65 = arith.mulf %64, %15 : vector<16x32xf32>
    %66 = arith.addf %63, %65 : vector<16x32xf32>
    %67 = vector.broadcast %59 : vector<16x1xf32> to vector<16x32xf32>
    %68 = arith.mulf %67, %42 : vector<16x32xf32>
    %69 = vector.broadcast %61 : vector<16x1xf32> to vector<16x32xf32>
    %70 = arith.mulf %69, %15 : vector<16x32xf32>
    %71 = arith.addf %68, %70 : vector<16x32xf32>
    %72 = vector.extract_strided_slice %63 {offsets = [0, 0], sizes = [8, 32], strides = [1, 1]} : vector<16x32xf32> to vector<8x32xf32>
    %73 = arith.index_cast %c0_i32 : i32 to index
    %c0_28 = arith.constant 0 : index
    %c0_29 = arith.constant 0 : index
    %74 = vector.load %arg11[%73, %c0_28, %c0_29] : memref<8x8x64xf32, #tpu.memory_space<vmem>>, vector<1x8x32xf32>
    %75 = vector.shape_cast %74 : vector<1x8x32xf32> to vector<8x32xf32>
    %76 = vector.shape_cast %72 : vector<8x32xf32> to vector<1x8x32xf32>
    tpu.vector_store %arg11[%73, %c0_28, %c0_29], %76 {strides = array<i32>} : memref<8x8x64xf32, #tpu.memory_space<vmem>>, vector<1x8x32xf32>,
    %77 = vector.extract_strided_slice %63 {offsets = [8, 0], sizes = [8, 32], strides = [1, 1]} : vector<16x32xf32> to vector<8x32xf32>
    %78 = arith.index_cast %16 : i32 to index
    %c0_30 = arith.constant 0 : index
    %c32 = arith.constant 32 : index
    %79 = vector.load %arg11[%78, %c0_30, %c32] : memref<8x8x64xf32, #tpu.memory_space<vmem>>, vector<1x8x32xf32>
    %80 = vector.shape_cast %79 : vector<1x8x32xf32> to vector<8x32xf32>
    %81 = vector.shape_cast %77 : vector<8x32xf32> to vector<1x8x32xf32>
    tpu.vector_store %arg11[%78, %c0_30, %c32], %81 {strides = array<i32>} : memref<8x8x64xf32, #tpu.memory_space<vmem>>, vector<1x8x32xf32>,
    %c1_i32 = arith.constant 1 : i32
    %c7_i32_31 = arith.constant 7 : i32
    %82 = arith.subi %c7_i32_31, %c1_i32 : i32
    %83 = arith.truncf %66 : vector<16x32xf32> to vector<16x32xbf16>
    %cst_32 = arith.constant dense<0.000000e+00> : vector<16x256xf32>
    %84 = tpu.matmul %83, %13, %cst_32 {dimension_numbers = #tpu.dot_dimension_numbers<[1], [0], [0], [1], [0, 0, 1, 1], [], []>} : vector<16x32xbf16>, vector<32x256xbf16>, vector<16x256xf32> -> vector<16x256xf32>
    %85 = arith.index_cast %c1_i32 : i32 to index
    %c0_33 = arith.constant 0 : index
    %c0_34 = arith.constant 0 : index
    %86 = vector.load %arg9[%85, %c0_33, %c0_34] : memref<8x8x128xf32, #tpu.memory_space<vmem>>, vector<1x8x128xf32>
    %87 = vector.shape_cast %86 : vector<1x8x128xf32> to vector<8x128xf32>
    %88 = vector.extract_strided_slice %84 {offsets = [0, 0], sizes = [8, 128], strides = [1, 1]} : vector<16x256xf32> to vector<8x128xf32>
    %89 = arith.addf %87, %88 : vector<8x128xf32>
    %90 = arith.index_cast %82 : i32 to index
    %c0_35 = arith.constant 0 : index
    %c0_36 = arith.constant 0 : index
    %91 = vector.load %arg10[%90, %c0_35, %c0_36] : memref<8x8x128xf32, #tpu.memory_space<vmem>>, vector<1x8x128xf32>
    %92 = vector.shape_cast %91 : vector<1x8x128xf32> to vector<8x128xf32>
    %93 = vector.extract_strided_slice %84 {offsets = [8, 128], sizes = [8, 128], strides = [1, 1]} : vector<16x256xf32> to vector<8x128xf32>
    %94 = arith.addf %92, %93 : vector<8x128xf32>
    %95 = tpu.concatenate %89, %94 in 0 : vector<8x128xf32>, vector<8x128xf32> -> vector<16x128xf32>
    %96 = arith.negf %95 : vector<16x128xf32>
    %97 = math.exp %96 : vector<16x128xf32>
    %cst_37 = arith.constant 1.000000e+00 : f32
    %98 = vector.broadcast %cst_37 : f32 to vector<16x128xf32>
    %99 = arith.addf %98, %97 : vector<16x128xf32>
    %100 = arith.divf %98, %99 : vector<16x128xf32>
    %101 = math.tanh %95 : vector<16x128xf32>
    %102 = vector.extract_strided_slice %100 {offsets = [0, 0], sizes = [16, 32], strides = [1, 1]} : vector<16x128xf32> to vector<16x32xf32>
    %103 = vector.extract_strided_slice %100 {offsets = [0, 32], sizes = [16, 32], strides = [1, 1]} : vector<16x128xf32> to vector<16x32xf32>
    %104 = vector.extract_strided_slice %101 {offsets = [0, 64], sizes = [16, 32], strides = [1, 1]} : vector<16x128xf32> to vector<16x32xf32>
    %105 = vector.extract_strided_slice %100 {offsets = [0, 96], sizes = [16, 32], strides = [1, 1]} : vector<16x128xf32> to vector<16x32xf32>
    %106 = arith.mulf %103, %71 : vector<16x32xf32>
    %107 = arith.mulf %102, %104 : vector<16x32xf32>
    %108 = arith.addf %106, %107 : vector<16x32xf32>
    %109 = math.tanh %108 : vector<16x32xf32>
    %110 = arith.mulf %105, %109 : vector<16x32xf32>
    %111 = vector.broadcast %c1_i32 : i32 to vector<8x1xi32>
    %112 = arith.subi %14, %111 : vector<8x1xi32>
    %113 = arith.sitofp %112 : vector<8x1xi32> to vector<8x1xf32>
    %cst_38 = arith.constant 0.000000e+00 : f32
    %cst_39 = arith.constant 1.000000e+00 : f32
    %114 = vector.broadcast %cst_38 : f32 to vector<8x1xf32>
    %115 = arith.maximumf %114, %113 : vector<8x1xf32>
    %116 = vector.broadcast %cst_39 : f32 to vector<8x1xf32>
    %117 = arith.minimumf %116, %115 : vector<8x1xf32>
    %118 = vector.broadcast %82 : i32 to vector<8x1xi32>
    %119 = arith.subi %14, %118 : vector<8x1xi32>
    %120 = arith.sitofp %119 : vector<8x1xi32> to vector<8x1xf32>
    %cst_40 = arith.constant 0.000000e+00 : f32
    %cst_41 = arith.constant 1.000000e+00 : f32
    %121 = vector.broadcast %cst_40 : f32 to vector<8x1xf32>
    %122 = arith.maximumf %121, %120 : vector<8x1xf32>
    %123 = vector.broadcast %cst_41 : f32 to vector<8x1xf32>
    %124 = arith.minimumf %123, %122 : vector<8x1xf32>
    %125 = tpu.concatenate %117, %124 in 0 : vector<8x1xf32>, vector<8x1xf32> -> vector<16x1xf32>
    %cst_42 = arith.constant 1.000000e+00 : f32
    %126 = vector.broadcast %cst_42 : f32 to vector<16x1xf32>
    %127 = arith.subf %126, %125 : vector<16x1xf32>
    %128 = vector.broadcast %125 : vector<16x1xf32> to vector<16x32xf32>
    %129 = arith.mulf %128, %110 : vector<16x32xf32>
    %130 = vector.broadcast %127 : vector<16x1xf32> to vector<16x32xf32>
    %131 = arith.mulf %130, %66 : vector<16x32xf32>
    %132 = arith.addf %129, %131 : vector<16x32xf32>
    %133 = vector.broadcast %125 : vector<16x1xf32> to vector<16x32xf32>
    %134 = arith.mulf %133, %108 : vector<16x32xf32>
    %135 = vector.broadcast %127 : vector<16x1xf32> to vector<16x32xf32>
    %136 = arith.mulf %135, %71 : vector<16x32xf32>
    %137 = arith.addf %134, %136 : vector<16x32xf32>
    %138 = vector.extract_strided_slice %129 {offsets = [0, 0], sizes = [8, 32], strides = [1, 1]} : vector<16x32xf32> to vector<8x32xf32>
    %139 = arith.index_cast %c1_i32 : i32 to index
    %c0_43 = arith.constant 0 : index
    %c0_44 = arith.constant 0 : index
    %140 = vector.load %arg11[%139, %c0_43, %c0_44] : memref<8x8x64xf32, #tpu.memory_space<vmem>>, vector<1x8x32xf32>
    %141 = vector.shape_cast %140 : vector<1x8x32xf32> to vector<8x32xf32>
    %142 = vector.shape_cast %138 : vector<8x32xf32> to vector<1x8x32xf32>
    tpu.vector_store %arg11[%139, %c0_43, %c0_44], %142 {strides = array<i32>} : memref<8x8x64xf32, #tpu.memory_space<vmem>>, vector<1x8x32xf32>,
    %143 = vector.extract_strided_slice %129 {offsets = [8, 0], sizes = [8, 32], strides = [1, 1]} : vector<16x32xf32> to vector<8x32xf32>
    %144 = arith.index_cast %82 : i32 to index
    %c0_45 = arith.constant 0 : index
    %c32_46 = arith.constant 32 : index
    %145 = vector.load %arg11[%144, %c0_45, %c32_46] : memref<8x8x64xf32, #tpu.memory_space<vmem>>, vector<1x8x32xf32>
    %146 = vector.shape_cast %145 : vector<1x8x32xf32> to vector<8x32xf32>
    %147 = vector.shape_cast %143 : vector<8x32xf32> to vector<1x8x32xf32>
    tpu.vector_store %arg11[%144, %c0_45, %c32_46], %147 {strides = array<i32>} : memref<8x8x64xf32, #tpu.memory_space<vmem>>, vector<1x8x32xf32>,
    %c2_i32 = arith.constant 2 : i32
    %c7_i32_47 = arith.constant 7 : i32
    %148 = arith.subi %c7_i32_47, %c2_i32 : i32
    %149 = arith.truncf %132 : vector<16x32xf32> to vector<16x32xbf16>
    %cst_48 = arith.constant dense<0.000000e+00> : vector<16x256xf32>
    %150 = tpu.matmul %149, %13, %cst_48 {dimension_numbers = #tpu.dot_dimension_numbers<[1], [0], [0], [1], [0, 0, 1, 1], [], []>} : vector<16x32xbf16>, vector<32x256xbf16>, vector<16x256xf32> -> vector<16x256xf32>
    %151 = arith.index_cast %c2_i32 : i32 to index
    %c0_49 = arith.constant 0 : index
    %c0_50 = arith.constant 0 : index
    %152 = vector.load %arg9[%151, %c0_49, %c0_50] : memref<8x8x128xf32, #tpu.memory_space<vmem>>, vector<1x8x128xf32>
    %153 = vector.shape_cast %152 : vector<1x8x128xf32> to vector<8x128xf32>
    %154 = vector.extract_strided_slice %150 {offsets = [0, 0], sizes = [8, 128], strides = [1, 1]} : vector<16x256xf32> to vector<8x128xf32>
    %155 = arith.addf %153, %154 : vector<8x128xf32>
    %156 = arith.index_cast %148 : i32 to index
    %c0_51 = arith.constant 0 : index
    %c0_52 = arith.constant 0 : index
    %157 = vector.load %arg10[%156, %c0_51, %c0_52] : memref<8x8x128xf32, #tpu.memory_space<vmem>>, vector<1x8x128xf32>
    %158 = vector.shape_cast %157 : vector<1x8x128xf32> to vector<8x128xf32>
    %159 = vector.extract_strided_slice %150 {offsets = [8, 128], sizes = [8, 128], strides = [1, 1]} : vector<16x256xf32> to vector<8x128xf32>
    %160 = arith.addf %158, %159 : vector<8x128xf32>
    %161 = tpu.concatenate %155, %160 in 0 : vector<8x128xf32>, vector<8x128xf32> -> vector<16x128xf32>
    %162 = arith.negf %161 : vector<16x128xf32>
    %163 = math.exp %162 : vector<16x128xf32>
    %cst_53 = arith.constant 1.000000e+00 : f32
    %164 = vector.broadcast %cst_53 : f32 to vector<16x128xf32>
    %165 = arith.addf %164, %163 : vector<16x128xf32>
    %166 = arith.divf %164, %165 : vector<16x128xf32>
    %167 = math.tanh %161 : vector<16x128xf32>
    %168 = vector.extract_strided_slice %166 {offsets = [0, 0], sizes = [16, 32], strides = [1, 1]} : vector<16x128xf32> to vector<16x32xf32>
    %169 = vector.extract_strided_slice %166 {offsets = [0, 32], sizes = [16, 32], strides = [1, 1]} : vector<16x128xf32> to vector<16x32xf32>
    %170 = vector.extract_strided_slice %167 {offsets = [0, 64], sizes = [16, 32], strides = [1, 1]} : vector<16x128xf32> to vector<16x32xf32>
    %171 = vector.extract_strided_slice %166 {offsets = [0, 96], sizes = [16, 32], strides = [1, 1]} : vector<16x128xf32> to vector<16x32xf32>
    %172 = arith.mulf %169, %137 : vector<16x32xf32>
    %173 = arith.mulf %168, %170 : vector<16x32xf32>
    %174 = arith.addf %172, %173 : vector<16x32xf32>
    %175 = math.tanh %174 : vector<16x32xf32>
    %176 = arith.mulf %171, %175 : vector<16x32xf32>
    %177 = vector.broadcast %c2_i32 : i32 to vector<8x1xi32>
    %178 = arith.subi %14, %177 : vector<8x1xi32>
    %179 = arith.sitofp %178 : vector<8x1xi32> to vector<8x1xf32>
    %cst_54 = arith.constant 0.000000e+00 : f32
    %cst_55 = arith.constant 1.000000e+00 : f32
    %180 = vector.broadcast %cst_54 : f32 to vector<8x1xf32>
    %181 = arith.maximumf %180, %179 : vector<8x1xf32>
    %182 = vector.broadcast %cst_55 : f32 to vector<8x1xf32>
    %183 = arith.minimumf %182, %181 : vector<8x1xf32>
    %184 = vector.broadcast %148 : i32 to vector<8x1xi32>
    %185 = arith.subi %14, %184 : vector<8x1xi32>
    %186 = arith.sitofp %185 : vector<8x1xi32> to vector<8x1xf32>
    %cst_56 = arith.constant 0.000000e+00 : f32
    %cst_57 = arith.constant 1.000000e+00 : f32
    %187 = vector.broadcast %cst_56 : f32 to vector<8x1xf32>
    %188 = arith.maximumf %187, %186 : vector<8x1xf32>
    %189 = vector.broadcast %cst_57 : f32 to vector<8x1xf32>
    %190 = arith.minimumf %189, %188 : vector<8x1xf32>
    %191 = tpu.concatenate %183, %190 in 0 : vector<8x1xf32>, vector<8x1xf32> -> vector<16x1xf32>
    %cst_58 = arith.constant 1.000000e+00 : f32
    %192 = vector.broadcast %cst_58 : f32 to vector<16x1xf32>
    %193 = arith.subf %192, %191 : vector<16x1xf32>
    %194 = vector.broadcast %191 : vector<16x1xf32> to vector<16x32xf32>
    %195 = arith.mulf %194, %176 : vector<16x32xf32>
    %196 = vector.broadcast %193 : vector<16x1xf32> to vector<16x32xf32>
    %197 = arith.mulf %196, %132 : vector<16x32xf32>
    %198 = arith.addf %195, %197 : vector<16x32xf32>
    %199 = vector.broadcast %191 : vector<16x1xf32> to vector<16x32xf32>
    %200 = arith.mulf %199, %174 : vector<16x32xf32>
    %201 = vector.broadcast %193 : vector<16x1xf32> to vector<16x32xf32>
    %202 = arith.mulf %201, %137 : vector<16x32xf32>
    %203 = arith.addf %200, %202 : vector<16x32xf32>
    %204 = vector.extract_strided_slice %195 {offsets = [0, 0], sizes = [8, 32], strides = [1, 1]} : vector<16x32xf32> to vector<8x32xf32>
    %205 = arith.index_cast %c2_i32 : i32 to index
    %c0_59 = arith.constant 0 : index
    %c0_60 = arith.constant 0 : index
    %206 = vector.load %arg11[%205, %c0_59, %c0_60] : memref<8x8x64xf32, #tpu.memory_space<vmem>>, vector<1x8x32xf32>
    %207 = vector.shape_cast %206 : vector<1x8x32xf32> to vector<8x32xf32>
    %208 = vector.shape_cast %204 : vector<8x32xf32> to vector<1x8x32xf32>
    tpu.vector_store %arg11[%205, %c0_59, %c0_60], %208 {strides = array<i32>} : memref<8x8x64xf32, #tpu.memory_space<vmem>>, vector<1x8x32xf32>,
    %209 = vector.extract_strided_slice %195 {offsets = [8, 0], sizes = [8, 32], strides = [1, 1]} : vector<16x32xf32> to vector<8x32xf32>
    %210 = arith.index_cast %148 : i32 to index
    %c0_61 = arith.constant 0 : index
    %c32_62 = arith.constant 32 : index
    %211 = vector.load %arg11[%210, %c0_61, %c32_62] : memref<8x8x64xf32, #tpu.memory_space<vmem>>, vector<1x8x32xf32>
    %212 = vector.shape_cast %211 : vector<1x8x32xf32> to vector<8x32xf32>
    %213 = vector.shape_cast %209 : vector<8x32xf32> to vector<1x8x32xf32>
    tpu.vector_store %arg11[%210, %c0_61, %c32_62], %213 {strides = array<i32>} : memref<8x8x64xf32, #tpu.memory_space<vmem>>, vector<1x8x32xf32>,
    %c3_i32 = arith.constant 3 : i32
    %c7_i32_63 = arith.constant 7 : i32
    %214 = arith.subi %c7_i32_63, %c3_i32 : i32
    %215 = arith.truncf %198 : vector<16x32xf32> to vector<16x32xbf16>
    %cst_64 = arith.constant dense<0.000000e+00> : vector<16x256xf32>
    %216 = tpu.matmul %215, %13, %cst_64 {dimension_numbers = #tpu.dot_dimension_numbers<[1], [0], [0], [1], [0, 0, 1, 1], [], []>} : vector<16x32xbf16>, vector<32x256xbf16>, vector<16x256xf32> -> vector<16x256xf32>
    %217 = arith.index_cast %c3_i32 : i32 to index
    %c0_65 = arith.constant 0 : index
    %c0_66 = arith.constant 0 : index
    %218 = vector.load %arg9[%217, %c0_65, %c0_66] : memref<8x8x128xf32, #tpu.memory_space<vmem>>, vector<1x8x128xf32>
    %219 = vector.shape_cast %218 : vector<1x8x128xf32> to vector<8x128xf32>
    %220 = vector.extract_strided_slice %216 {offsets = [0, 0], sizes = [8, 128], strides = [1, 1]} : vector<16x256xf32> to vector<8x128xf32>
    %221 = arith.addf %219, %220 : vector<8x128xf32>
    %222 = arith.index_cast %214 : i32 to index
    %c0_67 = arith.constant 0 : index
    %c0_68 = arith.constant 0 : index
    %223 = vector.load %arg10[%222, %c0_67, %c0_68] : memref<8x8x128xf32, #tpu.memory_space<vmem>>, vector<1x8x128xf32>
    %224 = vector.shape_cast %223 : vector<1x8x128xf32> to vector<8x128xf32>
    %225 = vector.extract_strided_slice %216 {offsets = [8, 128], sizes = [8, 128], strides = [1, 1]} : vector<16x256xf32> to vector<8x128xf32>
    %226 = arith.addf %224, %225 : vector<8x128xf32>
    %227 = tpu.concatenate %221, %226 in 0 : vector<8x128xf32>, vector<8x128xf32> -> vector<16x128xf32>
    %228 = arith.negf %227 : vector<16x128xf32>
    %229 = math.exp %228 : vector<16x128xf32>
    %cst_69 = arith.constant 1.000000e+00 : f32
    %230 = vector.broadcast %cst_69 : f32 to vector<16x128xf32>
    %231 = arith.addf %230, %229 : vector<16x128xf32>
    %232 = arith.divf %230, %231 : vector<16x128xf32>
    %233 = math.tanh %227 : vector<16x128xf32>
    %234 = vector.extract_strided_slice %232 {offsets = [0, 0], sizes = [16, 32], strides = [1, 1]} : vector<16x128xf32> to vector<16x32xf32>
    %235 = vector.extract_strided_slice %232 {offsets = [0, 32], sizes = [16, 32], strides = [1, 1]} : vector<16x128xf32> to vector<16x32xf32>
    %236 = vector.extract_strided_slice %233 {offsets = [0, 64], sizes = [16, 32], strides = [1, 1]} : vector<16x128xf32> to vector<16x32xf32>
    %237 = vector.extract_strided_slice %232 {offsets = [0, 96], sizes = [16, 32], strides = [1, 1]} : vector<16x128xf32> to vector<16x32xf32>
    %238 = arith.mulf %235, %203 : vector<16x32xf32>
    %239 = arith.mulf %234, %236 : vector<16x32xf32>
    %240 = arith.addf %238, %239 : vector<16x32xf32>
    %241 = math.tanh %240 : vector<16x32xf32>
    %242 = arith.mulf %237, %241 : vector<16x32xf32>
    %243 = vector.broadcast %c3_i32 : i32 to vector<8x1xi32>
    %244 = arith.subi %14, %243 : vector<8x1xi32>
    %245 = arith.sitofp %244 : vector<8x1xi32> to vector<8x1xf32>
    %cst_70 = arith.constant 0.000000e+00 : f32
    %cst_71 = arith.constant 1.000000e+00 : f32
    %246 = vector.broadcast %cst_70 : f32 to vector<8x1xf32>
    %247 = arith.maximumf %246, %245 : vector<8x1xf32>
    %248 = vector.broadcast %cst_71 : f32 to vector<8x1xf32>
    %249 = arith.minimumf %248, %247 : vector<8x1xf32>
    %250 = vector.broadcast %214 : i32 to vector<8x1xi32>
    %251 = arith.subi %14, %250 : vector<8x1xi32>
    %252 = arith.sitofp %251 : vector<8x1xi32> to vector<8x1xf32>
    %cst_72 = arith.constant 0.000000e+00 : f32
    %cst_73 = arith.constant 1.000000e+00 : f32
    %253 = vector.broadcast %cst_72 : f32 to vector<8x1xf32>
    %254 = arith.maximumf %253, %252 : vector<8x1xf32>
    %255 = vector.broadcast %cst_73 : f32 to vector<8x1xf32>
    %256 = arith.minimumf %255, %254 : vector<8x1xf32>
    %257 = tpu.concatenate %249, %256 in 0 : vector<8x1xf32>, vector<8x1xf32> -> vector<16x1xf32>
    %cst_74 = arith.constant 1.000000e+00 : f32
    %258 = vector.broadcast %cst_74 : f32 to vector<16x1xf32>
    %259 = arith.subf %258, %257 : vector<16x1xf32>
    %260 = vector.broadcast %257 : vector<16x1xf32> to vector<16x32xf32>
    %261 = arith.mulf %260, %242 : vector<16x32xf32>
    %262 = vector.broadcast %259 : vector<16x1xf32> to vector<16x32xf32>
    %263 = arith.mulf %262, %198 : vector<16x32xf32>
    %264 = arith.addf %261, %263 : vector<16x32xf32>
    %265 = vector.broadcast %257 : vector<16x1xf32> to vector<16x32xf32>
    %266 = arith.mulf %265, %240 : vector<16x32xf32>
    %267 = vector.broadcast %259 : vector<16x1xf32> to vector<16x32xf32>
    %268 = arith.mulf %267, %203 : vector<16x32xf32>
    %269 = arith.addf %266, %268 : vector<16x32xf32>
    %270 = vector.extract_strided_slice %261 {offsets = [0, 0], sizes = [8, 32], strides = [1, 1]} : vector<16x32xf32> to vector<8x32xf32>
    %271 = arith.index_cast %c3_i32 : i32 to index
    %c0_75 = arith.constant 0 : index
    %c0_76 = arith.constant 0 : index
    %272 = vector.load %arg11[%271, %c0_75, %c0_76] : memref<8x8x64xf32, #tpu.memory_space<vmem>>, vector<1x8x32xf32>
    %273 = vector.shape_cast %272 : vector<1x8x32xf32> to vector<8x32xf32>
    %274 = vector.shape_cast %270 : vector<8x32xf32> to vector<1x8x32xf32>
    tpu.vector_store %arg11[%271, %c0_75, %c0_76], %274 {strides = array<i32>} : memref<8x8x64xf32, #tpu.memory_space<vmem>>, vector<1x8x32xf32>,
    %275 = vector.extract_strided_slice %261 {offsets = [8, 0], sizes = [8, 32], strides = [1, 1]} : vector<16x32xf32> to vector<8x32xf32>
    %276 = arith.index_cast %214 : i32 to index
    %c0_77 = arith.constant 0 : index
    %c32_78 = arith.constant 32 : index
    %277 = vector.load %arg11[%276, %c0_77, %c32_78] : memref<8x8x64xf32, #tpu.memory_space<vmem>>, vector<1x8x32xf32>
    %278 = vector.shape_cast %277 : vector<1x8x32xf32> to vector<8x32xf32>
    %279 = vector.shape_cast %275 : vector<8x32xf32> to vector<1x8x32xf32>
    tpu.vector_store %arg11[%276, %c0_77, %c32_78], %279 {strides = array<i32>} : memref<8x8x64xf32, #tpu.memory_space<vmem>>, vector<1x8x32xf32>,
    %c4_i32 = arith.constant 4 : i32
    %c7_i32_79 = arith.constant 7 : i32
    %280 = arith.subi %c7_i32_79, %c4_i32 : i32
    %281 = arith.truncf %264 : vector<16x32xf32> to vector<16x32xbf16>
    %cst_80 = arith.constant dense<0.000000e+00> : vector<16x256xf32>
    %282 = tpu.matmul %281, %13, %cst_80 {dimension_numbers = #tpu.dot_dimension_numbers<[1], [0], [0], [1], [0, 0, 1, 1], [], []>} : vector<16x32xbf16>, vector<32x256xbf16>, vector<16x256xf32> -> vector<16x256xf32>
    %283 = arith.index_cast %c4_i32 : i32 to index
    %c0_81 = arith.constant 0 : index
    %c0_82 = arith.constant 0 : index
    %284 = vector.load %arg9[%283, %c0_81, %c0_82] : memref<8x8x128xf32, #tpu.memory_space<vmem>>, vector<1x8x128xf32>
    %285 = vector.shape_cast %284 : vector<1x8x128xf32> to vector<8x128xf32>
    %286 = vector.extract_strided_slice %282 {offsets = [0, 0], sizes = [8, 128], strides = [1, 1]} : vector<16x256xf32> to vector<8x128xf32>
    %287 = arith.addf %285, %286 : vector<8x128xf32>
    %288 = arith.index_cast %280 : i32 to index
    %c0_83 = arith.constant 0 : index
    %c0_84 = arith.constant 0 : index
    %289 = vector.load %arg10[%288, %c0_83, %c0_84] : memref<8x8x128xf32, #tpu.memory_space<vmem>>, vector<1x8x128xf32>
    %290 = vector.shape_cast %289 : vector<1x8x128xf32> to vector<8x128xf32>
    %291 = vector.extract_strided_slice %282 {offsets = [8, 128], sizes = [8, 128], strides = [1, 1]} : vector<16x256xf32> to vector<8x128xf32>
    %292 = arith.addf %290, %291 : vector<8x128xf32>
    %293 = tpu.concatenate %287, %292 in 0 : vector<8x128xf32>, vector<8x128xf32> -> vector<16x128xf32>
    %294 = arith.negf %293 : vector<16x128xf32>
    %295 = math.exp %294 : vector<16x128xf32>
    %cst_85 = arith.constant 1.000000e+00 : f32
    %296 = vector.broadcast %cst_85 : f32 to vector<16x128xf32>
    %297 = arith.addf %296, %295 : vector<16x128xf32>
    %298 = arith.divf %296, %297 : vector<16x128xf32>
    %299 = math.tanh %293 : vector<16x128xf32>
    %300 = vector.extract_strided_slice %298 {offsets = [0, 0], sizes = [16, 32], strides = [1, 1]} : vector<16x128xf32> to vector<16x32xf32>
    %301 = vector.extract_strided_slice %298 {offsets = [0, 32], sizes = [16, 32], strides = [1, 1]} : vector<16x128xf32> to vector<16x32xf32>
    %302 = vector.extract_strided_slice %299 {offsets = [0, 64], sizes = [16, 32], strides = [1, 1]} : vector<16x128xf32> to vector<16x32xf32>
    %303 = vector.extract_strided_slice %298 {offsets = [0, 96], sizes = [16, 32], strides = [1, 1]} : vector<16x128xf32> to vector<16x32xf32>
    %304 = arith.mulf %301, %269 : vector<16x32xf32>
    %305 = arith.mulf %300, %302 : vector<16x32xf32>
    %306 = arith.addf %304, %305 : vector<16x32xf32>
    %307 = math.tanh %306 : vector<16x32xf32>
    %308 = arith.mulf %303, %307 : vector<16x32xf32>
    %309 = vector.broadcast %c4_i32 : i32 to vector<8x1xi32>
    %310 = arith.subi %14, %309 : vector<8x1xi32>
    %311 = arith.sitofp %310 : vector<8x1xi32> to vector<8x1xf32>
    %cst_86 = arith.constant 0.000000e+00 : f32
    %cst_87 = arith.constant 1.000000e+00 : f32
    %312 = vector.broadcast %cst_86 : f32 to vector<8x1xf32>
    %313 = arith.maximumf %312, %311 : vector<8x1xf32>
    %314 = vector.broadcast %cst_87 : f32 to vector<8x1xf32>
    %315 = arith.minimumf %314, %313 : vector<8x1xf32>
    %316 = vector.broadcast %280 : i32 to vector<8x1xi32>
    %317 = arith.subi %14, %316 : vector<8x1xi32>
    %318 = arith.sitofp %317 : vector<8x1xi32> to vector<8x1xf32>
    %cst_88 = arith.constant 0.000000e+00 : f32
    %cst_89 = arith.constant 1.000000e+00 : f32
    %319 = vector.broadcast %cst_88 : f32 to vector<8x1xf32>
    %320 = arith.maximumf %319, %318 : vector<8x1xf32>
    %321 = vector.broadcast %cst_89 : f32 to vector<8x1xf32>
    %322 = arith.minimumf %321, %320 : vector<8x1xf32>
    %323 = tpu.concatenate %315, %322 in 0 : vector<8x1xf32>, vector<8x1xf32> -> vector<16x1xf32>
    %cst_90 = arith.constant 1.000000e+00 : f32
    %324 = vector.broadcast %cst_90 : f32 to vector<16x1xf32>
    %325 = arith.subf %324, %323 : vector<16x1xf32>
    %326 = vector.broadcast %323 : vector<16x1xf32> to vector<16x32xf32>
    %327 = arith.mulf %326, %308 : vector<16x32xf32>
    %328 = vector.broadcast %325 : vector<16x1xf32> to vector<16x32xf32>
    %329 = arith.mulf %328, %264 : vector<16x32xf32>
    %330 = arith.addf %327, %329 : vector<16x32xf32>
    %331 = vector.broadcast %323 : vector<16x1xf32> to vector<16x32xf32>
    %332 = arith.mulf %331, %306 : vector<16x32xf32>
    %333 = vector.broadcast %325 : vector<16x1xf32> to vector<16x32xf32>
    %334 = arith.mulf %333, %269 : vector<16x32xf32>
    %335 = arith.addf %332, %334 : vector<16x32xf32>
    %336 = vector.extract_strided_slice %327 {offsets = [0, 0], sizes = [8, 32], strides = [1, 1]} : vector<16x32xf32> to vector<8x32xf32>
    %337 = arith.index_cast %c4_i32 : i32 to index
    %c0_91 = arith.constant 0 : index
    %c0_92 = arith.constant 0 : index
    %338 = vector.load %arg11[%337, %c0_91, %c0_92] : memref<8x8x64xf32, #tpu.memory_space<vmem>>, vector<1x8x32xf32>
    %339 = vector.shape_cast %338 : vector<1x8x32xf32> to vector<8x32xf32>
    %340 = vector.shape_cast %336 : vector<8x32xf32> to vector<1x8x32xf32>
    tpu.vector_store %arg11[%337, %c0_91, %c0_92], %340 {strides = array<i32>} : memref<8x8x64xf32, #tpu.memory_space<vmem>>, vector<1x8x32xf32>,
    %341 = vector.extract_strided_slice %327 {offsets = [8, 0], sizes = [8, 32], strides = [1, 1]} : vector<16x32xf32> to vector<8x32xf32>
    %342 = arith.index_cast %280 : i32 to index
    %c0_93 = arith.constant 0 : index
    %c32_94 = arith.constant 32 : index
    %343 = vector.load %arg11[%342, %c0_93, %c32_94] : memref<8x8x64xf32, #tpu.memory_space<vmem>>, vector<1x8x32xf32>
    %344 = vector.shape_cast %343 : vector<1x8x32xf32> to vector<8x32xf32>
    %345 = vector.shape_cast %341 : vector<8x32xf32> to vector<1x8x32xf32>
    tpu.vector_store %arg11[%342, %c0_93, %c32_94], %345 {strides = array<i32>} : memref<8x8x64xf32, #tpu.memory_space<vmem>>, vector<1x8x32xf32>,
    %c5_i32 = arith.constant 5 : i32
    %c7_i32_95 = arith.constant 7 : i32
    %346 = arith.subi %c7_i32_95, %c5_i32 : i32
    %347 = arith.truncf %330 : vector<16x32xf32> to vector<16x32xbf16>
    %cst_96 = arith.constant dense<0.000000e+00> : vector<16x256xf32>
    %348 = tpu.matmul %347, %13, %cst_96 {dimension_numbers = #tpu.dot_dimension_numbers<[1], [0], [0], [1], [0, 0, 1, 1], [], []>} : vector<16x32xbf16>, vector<32x256xbf16>, vector<16x256xf32> -> vector<16x256xf32>
    %349 = arith.index_cast %c5_i32 : i32 to index
    %c0_97 = arith.constant 0 : index
    %c0_98 = arith.constant 0 : index
    %350 = vector.load %arg9[%349, %c0_97, %c0_98] : memref<8x8x128xf32, #tpu.memory_space<vmem>>, vector<1x8x128xf32>
    %351 = vector.shape_cast %350 : vector<1x8x128xf32> to vector<8x128xf32>
    %352 = vector.extract_strided_slice %348 {offsets = [0, 0], sizes = [8, 128], strides = [1, 1]} : vector<16x256xf32> to vector<8x128xf32>
    %353 = arith.addf %351, %352 : vector<8x128xf32>
    %354 = arith.index_cast %346 : i32 to index
    %c0_99 = arith.constant 0 : index
    %c0_100 = arith.constant 0 : index
    %355 = vector.load %arg10[%354, %c0_99, %c0_100] : memref<8x8x128xf32, #tpu.memory_space<vmem>>, vector<1x8x128xf32>
    %356 = vector.shape_cast %355 : vector<1x8x128xf32> to vector<8x128xf32>
    %357 = vector.extract_strided_slice %348 {offsets = [8, 128], sizes = [8, 128], strides = [1, 1]} : vector<16x256xf32> to vector<8x128xf32>
    %358 = arith.addf %356, %357 : vector<8x128xf32>
    %359 = tpu.concatenate %353, %358 in 0 : vector<8x128xf32>, vector<8x128xf32> -> vector<16x128xf32>
    %360 = arith.negf %359 : vector<16x128xf32>
    %361 = math.exp %360 : vector<16x128xf32>
    %cst_101 = arith.constant 1.000000e+00 : f32
    %362 = vector.broadcast %cst_101 : f32 to vector<16x128xf32>
    %363 = arith.addf %362, %361 : vector<16x128xf32>
    %364 = arith.divf %362, %363 : vector<16x128xf32>
    %365 = math.tanh %359 : vector<16x128xf32>
    %366 = vector.extract_strided_slice %364 {offsets = [0, 0], sizes = [16, 32], strides = [1, 1]} : vector<16x128xf32> to vector<16x32xf32>
    %367 = vector.extract_strided_slice %364 {offsets = [0, 32], sizes = [16, 32], strides = [1, 1]} : vector<16x128xf32> to vector<16x32xf32>
    %368 = vector.extract_strided_slice %365 {offsets = [0, 64], sizes = [16, 32], strides = [1, 1]} : vector<16x128xf32> to vector<16x32xf32>
    %369 = vector.extract_strided_slice %364 {offsets = [0, 96], sizes = [16, 32], strides = [1, 1]} : vector<16x128xf32> to vector<16x32xf32>
    %370 = arith.mulf %367, %335 : vector<16x32xf32>
    %371 = arith.mulf %366, %368 : vector<16x32xf32>
    %372 = arith.addf %370, %371 : vector<16x32xf32>
    %373 = math.tanh %372 : vector<16x32xf32>
    %374 = arith.mulf %369, %373 : vector<16x32xf32>
    %375 = vector.broadcast %c5_i32 : i32 to vector<8x1xi32>
    %376 = arith.subi %14, %375 : vector<8x1xi32>
    %377 = arith.sitofp %376 : vector<8x1xi32> to vector<8x1xf32>
    %cst_102 = arith.constant 0.000000e+00 : f32
    %cst_103 = arith.constant 1.000000e+00 : f32
    %378 = vector.broadcast %cst_102 : f32 to vector<8x1xf32>
    %379 = arith.maximumf %378, %377 : vector<8x1xf32>
    %380 = vector.broadcast %cst_103 : f32 to vector<8x1xf32>
    %381 = arith.minimumf %380, %379 : vector<8x1xf32>
    %382 = vector.broadcast %346 : i32 to vector<8x1xi32>
    %383 = arith.subi %14, %382 : vector<8x1xi32>
    %384 = arith.sitofp %383 : vector<8x1xi32> to vector<8x1xf32>
    %cst_104 = arith.constant 0.000000e+00 : f32
    %cst_105 = arith.constant 1.000000e+00 : f32
    %385 = vector.broadcast %cst_104 : f32 to vector<8x1xf32>
    %386 = arith.maximumf %385, %384 : vector<8x1xf32>
    %387 = vector.broadcast %cst_105 : f32 to vector<8x1xf32>
    %388 = arith.minimumf %387, %386 : vector<8x1xf32>
    %389 = tpu.concatenate %381, %388 in 0 : vector<8x1xf32>, vector<8x1xf32> -> vector<16x1xf32>
    %cst_106 = arith.constant 1.000000e+00 : f32
    %390 = vector.broadcast %cst_106 : f32 to vector<16x1xf32>
    %391 = arith.subf %390, %389 : vector<16x1xf32>
    %392 = vector.broadcast %389 : vector<16x1xf32> to vector<16x32xf32>
    %393 = arith.mulf %392, %374 : vector<16x32xf32>
    %394 = vector.broadcast %391 : vector<16x1xf32> to vector<16x32xf32>
    %395 = arith.mulf %394, %330 : vector<16x32xf32>
    %396 = arith.addf %393, %395 : vector<16x32xf32>
    %397 = vector.broadcast %389 : vector<16x1xf32> to vector<16x32xf32>
    %398 = arith.mulf %397, %372 : vector<16x32xf32>
    %399 = vector.broadcast %391 : vector<16x1xf32> to vector<16x32xf32>
    %400 = arith.mulf %399, %335 : vector<16x32xf32>
    %401 = arith.addf %398, %400 : vector<16x32xf32>
    %402 = vector.extract_strided_slice %393 {offsets = [0, 0], sizes = [8, 32], strides = [1, 1]} : vector<16x32xf32> to vector<8x32xf32>
    %403 = arith.index_cast %c5_i32 : i32 to index
    %c0_107 = arith.constant 0 : index
    %c0_108 = arith.constant 0 : index
    %404 = vector.load %arg11[%403, %c0_107, %c0_108] : memref<8x8x64xf32, #tpu.memory_space<vmem>>, vector<1x8x32xf32>
    %405 = vector.shape_cast %404 : vector<1x8x32xf32> to vector<8x32xf32>
    %406 = vector.shape_cast %402 : vector<8x32xf32> to vector<1x8x32xf32>
    tpu.vector_store %arg11[%403, %c0_107, %c0_108], %406 {strides = array<i32>} : memref<8x8x64xf32, #tpu.memory_space<vmem>>, vector<1x8x32xf32>,
    %407 = vector.extract_strided_slice %393 {offsets = [8, 0], sizes = [8, 32], strides = [1, 1]} : vector<16x32xf32> to vector<8x32xf32>
    %408 = arith.index_cast %346 : i32 to index
    %c0_109 = arith.constant 0 : index
    %c32_110 = arith.constant 32 : index
    %409 = vector.load %arg11[%408, %c0_109, %c32_110] : memref<8x8x64xf32, #tpu.memory_space<vmem>>, vector<1x8x32xf32>
    %410 = vector.shape_cast %409 : vector<1x8x32xf32> to vector<8x32xf32>
    %411 = vector.shape_cast %407 : vector<8x32xf32> to vector<1x8x32xf32>
    tpu.vector_store %arg11[%408, %c0_109, %c32_110], %411 {strides = array<i32>} : memref<8x8x64xf32, #tpu.memory_space<vmem>>, vector<1x8x32xf32>,
    %c6_i32 = arith.constant 6 : i32
    %c7_i32_111 = arith.constant 7 : i32
    %412 = arith.subi %c7_i32_111, %c6_i32 : i32
    %413 = arith.truncf %396 : vector<16x32xf32> to vector<16x32xbf16>
    %cst_112 = arith.constant dense<0.000000e+00> : vector<16x256xf32>
    %414 = tpu.matmul %413, %13, %cst_112 {dimension_numbers = #tpu.dot_dimension_numbers<[1], [0], [0], [1], [0, 0, 1, 1], [], []>} : vector<16x32xbf16>, vector<32x256xbf16>, vector<16x256xf32> -> vector<16x256xf32>
    %415 = arith.index_cast %c6_i32 : i32 to index
    %c0_113 = arith.constant 0 : index
    %c0_114 = arith.constant 0 : index
    %416 = vector.load %arg9[%415, %c0_113, %c0_114] : memref<8x8x128xf32, #tpu.memory_space<vmem>>, vector<1x8x128xf32>
    %417 = vector.shape_cast %416 : vector<1x8x128xf32> to vector<8x128xf32>
    %418 = vector.extract_strided_slice %414 {offsets = [0, 0], sizes = [8, 128], strides = [1, 1]} : vector<16x256xf32> to vector<8x128xf32>
    %419 = arith.addf %417, %418 : vector<8x128xf32>
    %420 = arith.index_cast %412 : i32 to index
    %c0_115 = arith.constant 0 : index
    %c0_116 = arith.constant 0 : index
    %421 = vector.load %arg10[%420, %c0_115, %c0_116] : memref<8x8x128xf32, #tpu.memory_space<vmem>>, vector<1x8x128xf32>
    %422 = vector.shape_cast %421 : vector<1x8x128xf32> to vector<8x128xf32>
    %423 = vector.extract_strided_slice %414 {offsets = [8, 128], sizes = [8, 128], strides = [1, 1]} : vector<16x256xf32> to vector<8x128xf32>
    %424 = arith.addf %422, %423 : vector<8x128xf32>
    %425 = tpu.concatenate %419, %424 in 0 : vector<8x128xf32>, vector<8x128xf32> -> vector<16x128xf32>
    %426 = arith.negf %425 : vector<16x128xf32>
    %427 = math.exp %426 : vector<16x128xf32>
    %cst_117 = arith.constant 1.000000e+00 : f32
    %428 = vector.broadcast %cst_117 : f32 to vector<16x128xf32>
    %429 = arith.addf %428, %427 : vector<16x128xf32>
    %430 = arith.divf %428, %429 : vector<16x128xf32>
    %431 = math.tanh %425 : vector<16x128xf32>
    %432 = vector.extract_strided_slice %430 {offsets = [0, 0], sizes = [16, 32], strides = [1, 1]} : vector<16x128xf32> to vector<16x32xf32>
    %433 = vector.extract_strided_slice %430 {offsets = [0, 32], sizes = [16, 32], strides = [1, 1]} : vector<16x128xf32> to vector<16x32xf32>
    %434 = vector.extract_strided_slice %431 {offsets = [0, 64], sizes = [16, 32], strides = [1, 1]} : vector<16x128xf32> to vector<16x32xf32>
    %435 = vector.extract_strided_slice %430 {offsets = [0, 96], sizes = [16, 32], strides = [1, 1]} : vector<16x128xf32> to vector<16x32xf32>
    %436 = arith.mulf %433, %401 : vector<16x32xf32>
    %437 = arith.mulf %432, %434 : vector<16x32xf32>
    %438 = arith.addf %436, %437 : vector<16x32xf32>
    %439 = math.tanh %438 : vector<16x32xf32>
    %440 = arith.mulf %435, %439 : vector<16x32xf32>
    %441 = vector.broadcast %c6_i32 : i32 to vector<8x1xi32>
    %442 = arith.subi %14, %441 : vector<8x1xi32>
    %443 = arith.sitofp %442 : vector<8x1xi32> to vector<8x1xf32>
    %cst_118 = arith.constant 0.000000e+00 : f32
    %cst_119 = arith.constant 1.000000e+00 : f32
    %444 = vector.broadcast %cst_118 : f32 to vector<8x1xf32>
    %445 = arith.maximumf %444, %443 : vector<8x1xf32>
    %446 = vector.broadcast %cst_119 : f32 to vector<8x1xf32>
    %447 = arith.minimumf %446, %445 : vector<8x1xf32>
    %448 = vector.broadcast %412 : i32 to vector<8x1xi32>
    %449 = arith.subi %14, %448 : vector<8x1xi32>
    %450 = arith.sitofp %449 : vector<8x1xi32> to vector<8x1xf32>
    %cst_120 = arith.constant 0.000000e+00 : f32
    %cst_121 = arith.constant 1.000000e+00 : f32
    %451 = vector.broadcast %cst_120 : f32 to vector<8x1xf32>
    %452 = arith.maximumf %451, %450 : vector<8x1xf32>
    %453 = vector.broadcast %cst_121 : f32 to vector<8x1xf32>
    %454 = arith.minimumf %453, %452 : vector<8x1xf32>
    %455 = tpu.concatenate %447, %454 in 0 : vector<8x1xf32>, vector<8x1xf32> -> vector<16x1xf32>
    %cst_122 = arith.constant 1.000000e+00 : f32
    %456 = vector.broadcast %cst_122 : f32 to vector<16x1xf32>
    %457 = arith.subf %456, %455 : vector<16x1xf32>
    %458 = vector.broadcast %455 : vector<16x1xf32> to vector<16x32xf32>
    %459 = arith.mulf %458, %440 : vector<16x32xf32>
    %460 = vector.broadcast %457 : vector<16x1xf32> to vector<16x32xf32>
    %461 = arith.mulf %460, %396 : vector<16x32xf32>
    %462 = arith.addf %459, %461 : vector<16x32xf32>
    %463 = vector.broadcast %455 : vector<16x1xf32> to vector<16x32xf32>
    %464 = arith.mulf %463, %438 : vector<16x32xf32>
    %465 = vector.broadcast %457 : vector<16x1xf32> to vector<16x32xf32>
    %466 = arith.mulf %465, %401 : vector<16x32xf32>
    %467 = arith.addf %464, %466 : vector<16x32xf32>
    %468 = vector.extract_strided_slice %459 {offsets = [0, 0], sizes = [8, 32], strides = [1, 1]} : vector<16x32xf32> to vector<8x32xf32>
    %469 = arith.index_cast %c6_i32 : i32 to index
    %c0_123 = arith.constant 0 : index
    %c0_124 = arith.constant 0 : index
    %470 = vector.load %arg11[%469, %c0_123, %c0_124] : memref<8x8x64xf32, #tpu.memory_space<vmem>>, vector<1x8x32xf32>
    %471 = vector.shape_cast %470 : vector<1x8x32xf32> to vector<8x32xf32>
    %472 = vector.shape_cast %468 : vector<8x32xf32> to vector<1x8x32xf32>
    tpu.vector_store %arg11[%469, %c0_123, %c0_124], %472 {strides = array<i32>} : memref<8x8x64xf32, #tpu.memory_space<vmem>>, vector<1x8x32xf32>,
    %473 = vector.extract_strided_slice %459 {offsets = [8, 0], sizes = [8, 32], strides = [1, 1]} : vector<16x32xf32> to vector<8x32xf32>
    %474 = arith.index_cast %412 : i32 to index
    %c0_125 = arith.constant 0 : index
    %c32_126 = arith.constant 32 : index
    %475 = vector.load %arg11[%474, %c0_125, %c32_126] : memref<8x8x64xf32, #tpu.memory_space<vmem>>, vector<1x8x32xf32>
    %476 = vector.shape_cast %475 : vector<1x8x32xf32> to vector<8x32xf32>
    %477 = vector.shape_cast %473 : vector<8x32xf32> to vector<1x8x32xf32>
    tpu.vector_store %arg11[%474, %c0_125, %c32_126], %477 {strides = array<i32>} : memref<8x8x64xf32, #tpu.memory_space<vmem>>, vector<1x8x32xf32>,
    %c7_i32_127 = arith.constant 7 : i32
    %c7_i32_128 = arith.constant 7 : i32
    %478 = arith.subi %c7_i32_128, %c7_i32_127 : i32
    %479 = arith.truncf %462 : vector<16x32xf32> to vector<16x32xbf16>
    %cst_129 = arith.constant dense<0.000000e+00> : vector<16x256xf32>
    %480 = tpu.matmul %479, %13, %cst_129 {dimension_numbers = #tpu.dot_dimension_numbers<[1], [0], [0], [1], [0, 0, 1, 1], [], []>} : vector<16x32xbf16>, vector<32x256xbf16>, vector<16x256xf32> -> vector<16x256xf32>
    %481 = arith.index_cast %c7_i32_127 : i32 to index
    %c0_130 = arith.constant 0 : index
    %c0_131 = arith.constant 0 : index
    %482 = vector.load %arg9[%481, %c0_130, %c0_131] : memref<8x8x128xf32, #tpu.memory_space<vmem>>, vector<1x8x128xf32>
    %483 = vector.shape_cast %482 : vector<1x8x128xf32> to vector<8x128xf32>
    %484 = vector.extract_strided_slice %480 {offsets = [0, 0], sizes = [8, 128], strides = [1, 1]} : vector<16x256xf32> to vector<8x128xf32>
    %485 = arith.addf %483, %484 : vector<8x128xf32>
    %486 = arith.index_cast %478 : i32 to index
    %c0_132 = arith.constant 0 : index
    %c0_133 = arith.constant 0 : index
    %487 = vector.load %arg10[%486, %c0_132, %c0_133] : memref<8x8x128xf32, #tpu.memory_space<vmem>>, vector<1x8x128xf32>
    %488 = vector.shape_cast %487 : vector<1x8x128xf32> to vector<8x128xf32>
    %489 = vector.extract_strided_slice %480 {offsets = [8, 128], sizes = [8, 128], strides = [1, 1]} : vector<16x256xf32> to vector<8x128xf32>
    %490 = arith.addf %488, %489 : vector<8x128xf32>
    %491 = tpu.concatenate %485, %490 in 0 : vector<8x128xf32>, vector<8x128xf32> -> vector<16x128xf32>
    %492 = arith.negf %491 : vector<16x128xf32>
    %493 = math.exp %492 : vector<16x128xf32>
    %cst_134 = arith.constant 1.000000e+00 : f32
    %494 = vector.broadcast %cst_134 : f32 to vector<16x128xf32>
    %495 = arith.addf %494, %493 : vector<16x128xf32>
    %496 = arith.divf %494, %495 : vector<16x128xf32>
    %497 = math.tanh %491 : vector<16x128xf32>
    %498 = vector.extract_strided_slice %496 {offsets = [0, 0], sizes = [16, 32], strides = [1, 1]} : vector<16x128xf32> to vector<16x32xf32>
    %499 = vector.extract_strided_slice %496 {offsets = [0, 32], sizes = [16, 32], strides = [1, 1]} : vector<16x128xf32> to vector<16x32xf32>
    %500 = vector.extract_strided_slice %497 {offsets = [0, 64], sizes = [16, 32], strides = [1, 1]} : vector<16x128xf32> to vector<16x32xf32>
    %501 = vector.extract_strided_slice %496 {offsets = [0, 96], sizes = [16, 32], strides = [1, 1]} : vector<16x128xf32> to vector<16x32xf32>
    %502 = arith.mulf %499, %467 : vector<16x32xf32>
    %503 = arith.mulf %498, %500 : vector<16x32xf32>
    %504 = arith.addf %502, %503 : vector<16x32xf32>
    %505 = math.tanh %504 : vector<16x32xf32>
    %506 = arith.mulf %501, %505 : vector<16x32xf32>
    %507 = vector.broadcast %c7_i32_127 : i32 to vector<8x1xi32>
    %508 = arith.subi %14, %507 : vector<8x1xi32>
    %509 = arith.sitofp %508 : vector<8x1xi32> to vector<8x1xf32>
    %cst_135 = arith.constant 0.000000e+00 : f32
    %cst_136 = arith.constant 1.000000e+00 : f32
    %510 = vector.broadcast %cst_135 : f32 to vector<8x1xf32>
    %511 = arith.maximumf %510, %509 : vector<8x1xf32>
    %512 = vector.broadcast %cst_136 : f32 to vector<8x1xf32>
    %513 = arith.minimumf %512, %511 : vector<8x1xf32>
    %514 = vector.broadcast %478 : i32 to vector<8x1xi32>
    %515 = arith.subi %14, %514 : vector<8x1xi32>
    %516 = arith.sitofp %515 : vector<8x1xi32> to vector<8x1xf32>
    %cst_137 = arith.constant 0.000000e+00 : f32
    %cst_138 = arith.constant 1.000000e+00 : f32
    %517 = vector.broadcast %cst_137 : f32 to vector<8x1xf32>
    %518 = arith.maximumf %517, %516 : vector<8x1xf32>
    %519 = vector.broadcast %cst_138 : f32 to vector<8x1xf32>
    %520 = arith.minimumf %519, %518 : vector<8x1xf32>
    %521 = tpu.concatenate %513, %520 in 0 : vector<8x1xf32>, vector<8x1xf32> -> vector<16x1xf32>
    %cst_139 = arith.constant 1.000000e+00 : f32
    %522 = vector.broadcast %cst_139 : f32 to vector<16x1xf32>
    %523 = arith.subf %522, %521 : vector<16x1xf32>
    %524 = vector.broadcast %521 : vector<16x1xf32> to vector<16x32xf32>
    %525 = arith.mulf %524, %506 : vector<16x32xf32>
    %526 = vector.broadcast %523 : vector<16x1xf32> to vector<16x32xf32>
    %527 = arith.mulf %526, %462 : vector<16x32xf32>
    %528 = arith.addf %525, %527 : vector<16x32xf32>
    %529 = vector.broadcast %521 : vector<16x1xf32> to vector<16x32xf32>
    %530 = arith.mulf %529, %504 : vector<16x32xf32>
    %531 = vector.broadcast %523 : vector<16x1xf32> to vector<16x32xf32>
    %532 = arith.mulf %531, %467 : vector<16x32xf32>
    %533 = arith.addf %530, %532 : vector<16x32xf32>
    %534 = vector.extract_strided_slice %525 {offsets = [0, 0], sizes = [8, 32], strides = [1, 1]} : vector<16x32xf32> to vector<8x32xf32>
    %535 = arith.index_cast %c7_i32_127 : i32 to index
    %c0_140 = arith.constant 0 : index
    %c0_141 = arith.constant 0 : index
    %536 = vector.load %arg11[%535, %c0_140, %c0_141] : memref<8x8x64xf32, #tpu.memory_space<vmem>>, vector<1x8x32xf32>
    %537 = vector.shape_cast %536 : vector<1x8x32xf32> to vector<8x32xf32>
    %538 = vector.shape_cast %534 : vector<8x32xf32> to vector<1x8x32xf32>
    tpu.vector_store %arg11[%535, %c0_140, %c0_141], %538 {strides = array<i32>} : memref<8x8x64xf32, #tpu.memory_space<vmem>>, vector<1x8x32xf32>,
    %539 = vector.extract_strided_slice %525 {offsets = [8, 0], sizes = [8, 32], strides = [1, 1]} : vector<16x32xf32> to vector<8x32xf32>
    %540 = arith.index_cast %478 : i32 to index
    %c0_142 = arith.constant 0 : index
    %c32_143 = arith.constant 32 : index
    %541 = vector.load %arg11[%540, %c0_142, %c32_143] : memref<8x8x64xf32, #tpu.memory_space<vmem>>, vector<1x8x32xf32>
    %542 = vector.shape_cast %541 : vector<1x8x32xf32> to vector<8x32xf32>
    %543 = vector.shape_cast %539 : vector<8x32xf32> to vector<1x8x32xf32>
    tpu.vector_store %arg11[%540, %c0_142, %c32_143], %543 {strides = array<i32>} : memref<8x8x64xf32, #tpu.memory_space<vmem>>, vector<1x8x32xf32>,
    %c8_i32 = arith.constant 8 : i32
    %c0_144 = arith.constant 0 : index
    %c0_145 = arith.constant 0 : index
    %c0_146 = arith.constant 0 : index
    %544 = vector.load %arg11[%c0_144, %c0_145, %c0_146] : memref<8x8x64xf32, #tpu.memory_space<vmem>>, vector<8x8x64xf32>
    %545 = vector.shape_cast %544 : vector<8x8x64xf32> to vector<64x64xf32>
    %546 = arith.truncf %545 : vector<64x64xf32> to vector<64x64xbf16>
    %c0_147 = arith.constant 0 : index
    %c0_148 = arith.constant 0 : index
    %547 = vector.load %arg6[%c0_147, %c0_148] : memref<64x128xbf16, #tpu.memory_space<vmem>>, vector<64x128xbf16>
    %cst_149 = arith.constant dense<0.000000e+00> : vector<64x128xf32>
    %548 = tpu.matmul %546, %547, %cst_149 {dimension_numbers = #tpu.dot_dimension_numbers<[1], [0], [0], [1], [0, 0, 1, 1], [], []>} : vector<64x64xbf16>, vector<64x128xbf16>, vector<64x128xf32> -> vector<64x128xf32>
    %c0_150 = arith.constant 0 : index
    %c0_151 = arith.constant 0 : index
    %549 = vector.load %arg7[%c0_150, %c0_151] : memref<1x128xf32, #tpu.memory_space<vmem>>, vector<1x128xf32>
    %550 = vector.broadcast %549 : vector<1x128xf32> to vector<64x128xf32>
    %551 = arith.addf %548, %550 : vector<64x128xf32>
    %552 = vector.shape_cast %551 : vector<64x128xf32> to vector<8x8x128xf32>
    %c0_152 = arith.constant 0 : index
    %c0_153 = arith.constant 0 : index
    %c0_154 = arith.constant 0 : index
    %553 = vector.load %arg8[%c0_152, %c0_153, %c0_154] : memref<8x8x128xf32, #tpu.memory_space<vmem>>, vector<8x8x128xf32>
    tpu.vector_store %arg8[%c0_152, %c0_153, %c0_154], %552 {strides = array<i32>} : memref<8x8x128xf32, #tpu.memory_space<vmem>>, vector<8x8x128xf32>,
    return
  }
  func.func @transform_0(%arg0: i32) -> (i32, i32, i32) {
    %c0_i32 = arith.constant 0 : i32
    %c0_i32_0 = arith.constant 0 : i32
    %c0_i32_1 = arith.constant 0 : i32
    return %c0_i32, %arg0, %c0_i32_0 : i32, i32, i32
  }
  func.func @transform_1(%arg0: i32) -> (i32, i32) {
    %c0_i32 = arith.constant 0 : i32
    %c0_i32_0 = arith.constant 0 : i32
    return %arg0, %c0_i32 : i32, i32
  }
  func.func @transform_2(%arg0: i32) -> (i32, i32) {
    %c0_i32 = arith.constant 0 : i32
    %c0_i32_0 = arith.constant 0 : i32
    %c0_i32_1 = arith.constant 0 : i32
    return %c0_i32, %c0_i32_0 : i32, i32
  }
  func.func @transform_3(%arg0: i32) -> (i32, i32) {
    %c0_i32 = arith.constant 0 : i32
    %c0_i32_0 = arith.constant 0 : i32
    %c0_i32_1 = arith.constant 0 : i32
    return %c0_i32, %c0_i32_0 : i32, i32
  }
  func.func @transform_4(%arg0: i32) -> (i32, i32) {
    %c0_i32 = arith.constant 0 : i32
    %c0_i32_0 = arith.constant 0 : i32
    %c0_i32_1 = arith.constant 0 : i32
    return %c0_i32, %c0_i32_0 : i32, i32
  }
  func.func @transform_5(%arg0: i32) -> (i32, i32) {
    %c0_i32 = arith.constant 0 : i32
    %c0_i32_0 = arith.constant 0 : i32
    %c0_i32_1 = arith.constant 0 : i32
    return %c0_i32, %c0_i32_0 : i32, i32
  }
  func.func @transform_6(%arg0: i32) -> (i32, i32) {
    %c0_i32 = arith.constant 0 : i32
    %c0_i32_0 = arith.constant 0 : i32
    %c0_i32_1 = arith.constant 0 : i32
    return %c0_i32, %c0_i32_0 : i32, i32
  }
  func.func @transform_7(%arg0: i32) -> (i32, i32, i32) {
    %c0_i32 = arith.constant 0 : i32
    %c0_i32_0 = arith.constant 0 : i32
    %c0_i32_1 = arith.constant 0 : i32
    return %c0_i32, %arg0, %c0_i32_0 : i32, i32, i32
  }
}

</mosaic_0001>

<bundles_post_ra>
// kernel: tpu_custom_call.1
= control target key start
LH: loop header
LB: loop body
LE: loop exit
PB: predicated region body
PF: predicated region fallthrough
CT: control target
= control target key end

     0   :  { %12 = vsyncpa [#allocation6], 0  ;;  %s2428_s0 = inlined_call_operand.hbm [shape: bf16[8,8,16], index: 0, kind: input, shape index: {}]   ;;  %s2429_s1 = inlined_call_operand.vmem [shape: s32[8,1], index: 1, kind: input, shape index: {}]   ;;  %s2430_s2 = inlined_call_operand.vmem [shape: bf16[16,256], index: 2, kind: input, shape index: {}]   ;;  %s2431_s3 = inlined_call_operand.vmem [shape: f32[1,256], index: 3, kind: input, shape index: {}]   ;;  %s2432_s4 = inlined_call_operand.hbm [shape: bf16[32,256], index: 4, kind: input, shape index: {}]   ;;  %s2433_s5 = inlined_call_operand.hbm [shape: bf16[64,128], index: 5, kind: input, shape index: {}]   ;;  %s2434_s6 = inlined_call_operand.vmem [shape: f32[1,128], index: 6, kind: input, shape index: {}]   ;;  %s2435_s7 = inlined_call_operand.hbm [shape: f32[8,8,128], index: 7, kind: output, shape index: {}]  }
   0x1   :  { %13 = vsyncpa [#allocation9], 0 }
   0x2   :  { %14 = vsyncpa [#allocation7], 0  ;;  %s1835_s24 = smov [#allocation8]   ;;  %s1741_s28 = scalar_lea.hbm %s2432_s4, 512 }
   0x3   :  { %s38_s25 = sshll.u32 %s1835_s24, 4  ;;  %p1742_p0 = scmp.ne.s32.totalorder %s2432_s4, %s1741_s28  ;;  %s39_s25 = int_to_ptr.vmem [resolvable:$true] %s38_s25 }
   0x4   :  { %p1745_p1 = scmp.lt.u32.totalorder %s1741_s28, %s2432_s4 }
   0x6   :  { %p1747_p2 = pnand %p1745_p1, %p1742_p0 }
   0x8   :  { %1750 = shalt.err (!%p1747_p2)
}
   0x9   :  { %s1751_s10 = scalar_lea.vmem %s39_s25, 512  ;;  %p1756_p4 = scmp.lt.s32.totalorder %s39_s25, %s39_s25 }
   0xa   :  { %p1752_p3 = scmp.ne.s32.totalorder %s39_s25, %s1751_s10  ;;  %p1757_p5 = scmp.lt.s32.totalorder %s1751_s10, %s1751_s10 }
   0xc   :  { %p1758_p6 = por %p1757_p5, %p1756_p4 }
   0xe   :  { %p1759_p7 = pnand %p1758_p6, %p1752_p3 }
  0x10   :  { %1762 = shalt.err (!%p1759_p7)
}
  0x11   :  { %s1836_s11 = smov 128   ;;  %s1837_s12 = smov 8  }
  0x12   :  { %44 = dma.hbm_to_vmem [thread:$0]  %s2432_s4, 512, %s39_s25, [#allocation9], %s1836_s11, %s1836_s11, %s1837_s12  }
  0x13   :  { %s1838_s15 = smov [#allocation5]   ;;  %s1763_s19 = scalar_lea.hbm %s2428_s0, 512 }
  0x14   :  { %s20_s16 = sshll.u32 %s1838_s15, 4  ;;  %p1764_p8 = scmp.ne.s32.totalorder %s2428_s0, %s1763_s19  ;;  %s21_s16 = int_to_ptr.vmem [resolvable:$true] %s20_s16 }
  0x15   :  { %p1767_p9 = scmp.lt.u32.totalorder %s1763_s19, %s2428_s0 }
  0x17   :  { %p1769_p10 = pnand %p1767_p9, %p1764_p8 }
  0x19   :  { %1772 = shalt.err (!%p1769_p10)
}
  0x1a   :  { %s1773_s24 = scalar_lea.vmem %s21_s16, 512  ;;  %p1778_p12 = scmp.lt.s32.totalorder %s21_s16, %s21_s16 }
  0x1b   :  { %p1774_p11 = scmp.ne.s32.totalorder %s21_s16, %s1773_s24  ;;  %p1779_p13 = scmp.lt.s32.totalorder %s1773_s24, %s1773_s24 }
  0x1d   :  { %p1780_p0 = por %p1779_p13, %p1778_p12 }
  0x1f   :  { %p1781_p1 = pnand %p1780_p0, %p1774_p11 }
  0x21   :  { %1784 = shalt.err (!%p1781_p1)
}
  0x22   :  { %s1839_s4 = smov 64   ;;  %s1840_s25 = smov 4  }
  0x23   :  { %26 = dma.hbm_to_vmem [thread:$0]  %s2428_s0, 512, %s21_s16, [#allocation6], %s1839_s4, %s1839_s4, %s1840_s25  }
  0x24   :  { %s1841_s28 = smov [#allocation10]   ;;  %s1785_s9 = scalar_lea.hbm %s2433_s5, 512 }
  0x25   :  { %s50_s29 = sshll.u32 %s1841_s28, 4  ;;  %p1786_p2 = scmp.ne.s32.totalorder %s2433_s5, %s1785_s9  ;;  %s51_s29 = int_to_ptr.vmem [resolvable:$true] %s50_s29 }
  0x26   :  { %p1789_p3 = scmp.lt.u32.totalorder %s1785_s9, %s2433_s5 }
  0x28   :  { %p1791_p4 = pnand %p1789_p3, %p1786_p2 }
  0x2a   :  { %1794 = shalt.err (!%p1791_p4)
}
  0x2b   :  { %s1795_s17 = scalar_lea.vmem %s51_s29, 512  ;;  %p1800_p6 = scmp.lt.s32.totalorder %s51_s29, %s51_s29 }
  0x2c   :  { %p1796_p5 = scmp.ne.s32.totalorder %s51_s29, %s1795_s17  ;;  %p1801_p7 = scmp.lt.s32.totalorder %s1795_s17, %s1795_s17 }
  0x2e   :  { %p1802_p8 = por %p1801_p7, %p1800_p6 }
  0x30   :  { %p1803_p9 = pnand %p1802_p8, %p1796_p5 }
  0x32   :  { %1806 = shalt.err (!%p1803_p9)
}
  0x33   :  { %56 = dma.hbm_to_vmem [thread:$0]  %s2433_s5, 512, %s51_s29, [#allocation9], %s1839_s4, %s1839_s4, %s1840_s25  }
  0x34   :  { %1829 = dma.done.wait [#allocation6], 512  }
  0x35   :  { %1830 = vsyncadd [#allocation6], 4294966784 }
  0x36   :  { %1831 = dma.done.wait [#allocation9], 1024  }
  0x37   :  { %1832 = vsyncadd [#allocation9], 4294966272  ;;  %v1842_v0 = vmov 0   ;;  %v1596_v1 = vld [vmem:[%s2430_s2 + $0x4] ss:$8 sps:$4 sm:$0xff]   ;;  %v1599_v3 = vld [vmem:[#allocation5 + $0x18] sm:$0xff]   ;;  %v81_v9 = vlaneseq }
  0x38   :  { %196 = vmatprep.mubr.bf16.mxu1 %v1842_v0  ;;  %166 = vmatprep.mubr.bf16.mxu0 %v1842_v0  ;;  %v1598_v2 = vld [vmem:[%s2430_s2] ss:$8 sps:$4 sm:$0xff]   ;;  %vm121_vm0 = vcmask 130048   ;;  %v1938_v4 = vld [vmem:[#allocation8 + $0x4] ss:$8 sps:$4 sm:$0xff]   ;;  %vm248_vm1 = vcmask 261120  }
  0x39   :  { %1594 = vset.pattern.permute.xlu0 %v1842_v0  ;;  %1595 = vset.pattern.permute.xlu1 %v1842_v0  ;;  %v1940_v5 = vld [vmem:[#allocation8] ss:$8 sps:$4 sm:$0xff]   ;;  %v1943_v7 = vld [vmem:[#allocation8 + $0x14] ss:$8 sps:$4 sm:$0xff]   ;;  %v1948_v8 = vld [vmem:[#allocation8 + $0x10] ss:$8 sps:$4 sm:$0xff]  }
  0x3a   :  { %1582 = vmatprep.subr.bf16.mxu1 %v1596_v1  ;;  %134 = vmatprep.subr.bf16.mxu0 %v1596_v1  ;;  %v1603_v6 = vld [vmem:[#allocation5] sm:$0xff]   ;;  %v82_v10 = vshrl.u32 %v81_v9, 7  ;;  %vm395_vm2 = vcmask 523520   ;;  %vm1401_vm3 = vcmask 523264  }
  0x3b   :  { %1583 = vmatpush1.bf16.msra.mxu1 %v1598_v2  ;;  %135 = vmatpush1.bf16.msra.mxu0 %v1598_v2  ;;  %v79_v12 = vld [vmem:[%s2431_s3] sm:$0x3] }
  0x3c   :  { %252 = vmatprep.subr.bf16.mxu1 %v1938_v4  ;;  %872 = vmatprep.subr.bf16.mxu0 %v1938_v4  ;;  %v83_v11 = vsub.s32 0, %v82_v10  ;;  %v87_v22 = vsub.s32 1, %v82_v10  ;;  %v1990_v32 = vld [vmem:[%s2429_s1] sm:$0xff]  ;;  %s1843_s1 = smov 32  }
  0x3d   :  { %v1521_v33 = vadd.s32 4294967289, %v1990_v32  ;;  %v346_v34 = vcvt.s32.f32 %v1990_v32 }
  0x3e   :  { %1514 = vmatmul.mubr.msk.bf16.vlgmr.msra.gmra.mrb[0].mxu1 %vm121_vm0, %v1599_v3  ;;  %1511 = vmatmul.mubr.msk.bf16.vlgmr.msra.gmra.mrb[0].mxu0 %vm121_vm0, %v1603_v6  ;;  %v1979_v19 = vrot.slane %v79_v12, %v83_v11  ;;  %v1984_v24 = vrot.slane %v79_v12, %v87_v22 }
  0x3f   :  { %253 = vmatpush1.bf16.msra.mxu1 %v1940_v5  ;;  %284 = vmatprep.mubr.bf16.mxu1 %v1842_v0  ;;  %v350_v35 = vcvt.s32.f32 %v1521_v33  ;;  %v347_v37 = vmax.f32 %v346_v34, 0.0 }
  0x40   :  { %254 = vmatprep.subr.bf16.mxu1 %v1943_v7  ;;  %176 = vmatprep.mubr.bf16.mxu0 %v1842_v0 }
  0x41   :  { %873 = vmatpush1.bf16.msra.mxu0 %v1940_v5  ;;  %v351_v38 = vmax.f32 %v350_v35, 0.0  ;;  %v348_v40 = vmin.f32 %v347_v37, 1.0 }
  0x42   :  { %874 = vmatprep.subr.bf16.mxu0 %v1943_v7 }
  0x43   :  { %255 = vmatpush1.bf16.msra.mxu1 %v1948_v8  ;;  %v352_v41 = vmin.f32 %v351_v38, 1.0  ;;  %v353_v55 = vsub.f32 1.0, %v348_v40 }
  0x44   :  { %404 = vmatprep.subr.bf16.mxu1 %v1938_v4 }
  0x45   :  { %875 = vmatpush1.bf16.msra.mxu0 %v1948_v8  ;;  %v354_v42 = vsub.f32 1.0, %v352_v41 }
  0x46   :  { %285 = vmatmul.mubr.bf16.vlgmr.msra.gmra.mrb[4].mxu1 %v1842_v0  ;;  %1120 = vmatprep.subr.bf16.mxu0 %v1938_v4 }
  0x47   :  { %405 = vmatpush1.bf16.msra.mxu1 %v1940_v5  ;;  %436 = vmatprep.mubr.bf16.mxu1 %v1842_v0 }
  0x48   :  { %406 = vmatprep.subr.bf16.mxu1 %v1943_v7 }
  0x4b   :  { %407 = vmatpush1.bf16.msra.mxu1 %v1948_v8 }
  0x4c   :  { %560 = vmatprep.subr.bf16.mxu1 %v1938_v4 }
 0x111   :  { %v1969_v13 = vpop.f32.mrb[0].mxu1  ;;  %v168_v14 = vpop.f32.mrb[0].mxu0 }
 0x112   :  { %v1971_v15 = vpop.f32.mrb[1].mxu1  ;;  %v1973_v16 = vpop.f32.mrb[1].mxu0  ;;  %v169_v23 = vadd.f32 %v168_v14, %v1979_v19 }
 0x113   :  { %v1975_v17 = vpop.f32.mrb[2].mxu1  ;;  %v1977_v18 = vpop.f32.mrb[2].mxu0  ;;  %v201_v34 = vadd.f32 %v1971_v15, %v1984_v24  ;;  %v1525_v15 = vadd.s32 4294967295, %v1990_v32 }
 0x114   :  { %v204_v20 = vpop.f32.mrb[3].mxu1  ;;  %v1981_v21 = vpop.f32.mrb[3].mxu0 }
 0x115   :  { %v205_v28 = vadd.f32 %v204_v20, %v1984_v24 }
 0x119   :  { %v286_v25 = vpop.f32.mrb[4].mxu1 }
 0x11a   :  { %v294_v26 = vadd.f32 %v286_v25, %v169_v23  ;;  %v288_v27 = vpop.f32.mrb[5].mxu1 }
 0x11b   :  { %v289_v29 = vpop.f32.mrb[6].mxu1 }
 0x11c   :  { %v290_v30 = vpop.f32.mrb[7].mxu1  ;;  %1613 = vtanh.f32 %v294_v26  ;;  %v1519_v43 = vmul.f32 -1.442695, %v294_v26  ;;  %v173_v29 = vadd.f32 %v1977_v18, %v1979_v19 }
 0x11d   :  { %v297_v31 = vadd.f32 %v290_v30, %v205_v28 }
 0x11f   :  { %1615 = vtanh.f32 %v297_v31  ;;  %v1520_v44 = vmul.f32 -1.442695, %v297_v31 }
 0x120   :  { %1617 = vpow2.f32 %v1519_v43 }
 0x121   :  { %1619 = vpow2.f32 %v1520_v44 }
 0x126   :  { %v1614_v36 = vpop.eup %1613 }
 0x127   :  { %316 = vrot.lane.b32.xlu0 %v1614_v36, %s1839_s4 }
 0x129   :  { %v1616_v39 = vpop.eup %1615 }
 0x12a   :  { %v1618_v45 = vpop.eup %1617 }
 0x12b   :  { %318 = vrot.lane.b32.xlu0 %v1616_v39, %s1839_s4  ;;  %v304_v46 = vadd.f32 1.0, %v1618_v45  ;;  %v1620_v47 = vpop.eup %1619  ;;  %v1526_v45 = vadd.s32 4294967290, %v1990_v32 }
 0x12c   :  { %v305_v48 = vadd.f32 1.0, %v1620_v47 }
 0x12d   :  { %1621 = vrcp.f32 %v304_v46  ;;  %v500_v46 = vcvt.s32.f32 %v1525_v15  ;;  %v504_v47 = vcvt.s32.f32 %v1526_v45 }
 0x12e   :  { %1623 = vrcp.f32 %v305_v48 }
 0x12f   :  { %357 = vperm.xlu0 %1594, %v348_v40   ;;  %v501_v48 = vmax.f32 %v500_v46, 0.0 }
 0x133   :  { %374 = vperm.xlu0 %1594, %v354_v42  }
 0x137   :  { %v1622_v49 = vpop.eup %1621 }
 0x138   :  { %v1624_v52 = vpop.eup %1623  ;;  %v312_v56 = vmul.f32 0.0, %v1622_v49 }
 0x139   :  { %v313_v59 = vmul.f32 0.0, %v1624_v52 }
 0x199   :  { %v317_v50 = vpop.permute.xlu0 %316 }
 0x19a   :  { %v322_v51 = vmul.f32 %v1622_v49, %v317_v50 }
 0x19c   :  { %326 = vrot.lane.b32.xlu1 %v322_v51, %s1843_s1 }
 0x19d   :  { %v319_v53 = vpop.permute.xlu0 %318 }
 0x19e   :  { %v323_v54 = vmul.f32 %v1624_v52, %v319_v53 }
 0x1a0   :  { %328 = vrot.lane.b32.xlu1 %v323_v54, %s1843_s1 }
 0x1a4   :  { %362 = vperm.xlu1 %1595, %v352_v41  }
 0x1a8   :  { %369 = vperm.xlu1 %1595, %v353_v55   ;;  %v502_v55 = vmin.f32 %v501_v48, 1.0 }
 0x1ae   :  { %v2008_v2 = vpop.permute.xlu0 %357 }
 0x1b2   :  { %v375_v6 = vpop.permute.xlu0 %374 }
 0x1b3   :  { %v2013_v20 = vmul.f32 0.0, %v375_v6 }
 0x20e   :  { %v327_v57 = vpop.permute.xlu1 %326 }
 0x20f   :  { %v1998_v58 = vadd.f32 %v327_v57, %v312_v56 }
 0x211   :  { %1625 = vtanh.f32 %v1998_v58 }
 0x212   :  { %v329_v60 = vpop.permute.xlu1 %328 }
 0x213   :  { %v2001_v61 = vadd.f32 %v329_v60, %v313_v59  ;;  %v507_v59 = vsub.f32 1.0, %v502_v55 }
 0x215   :  { %1627 = vtanh.f32 %v2001_v61 }
 0x21b   :  { %v1626_v62 = vpop.eup %1625 }
 0x21c   :  { %338 = vrot.lane.b32.xlu1 %v1626_v62, %s1839_s4  ;;  %v381_v62 = vmul.f32 %v2008_v2, %v1998_v58  ;;  %v1607_v58 = vld [vmem:[#allocation5 + $0x8] sm:$0xff]  }
 0x21d   :  { %1512 = vmatmul.mubr.msk.bf16.gmra.mrb[4].mxu0 %vm121_vm0, %v1607_v58  ;;  %v1530_v58 = vadd.s32 4294967294, %v1990_v32 }
 0x21e   :  { %186 = vmatprep.mubr.bf16.mxu0 %v1842_v0 }
 0x21f   :  { %v1628_v63 = vpop.eup %1627 }
 0x220   :  { %340 = vrot.lane.b32.xlu0 %v1628_v63, %s1839_s4 }
 0x223   :  { %v2006_v1 = vpop.permute.xlu1 %362 }
 0x224   :  { %v382_v63 = vmul.f32 %v2006_v1, %v2001_v61 }
 0x227   :  { %v370_v3 = vpop.permute.xlu1 %369 }
 0x228   :  { %v377_v22 = vmul.f32 0.0, %v370_v3 }
 0x22a   :  { %v2048_v3 = vadd.f32 %v381_v62, %v377_v22 }
 0x28e   :  { %v339_v9 = vpop.permute.xlu1 %338 }
 0x28f   :  { %v344_v10 = vmul.f32 %v1622_v49, %v339_v9 }
 0x291   :  { %v2011_v12 = vmul.f32 %v2008_v2, %v344_v10  ;;  %v2052_v10 = vadd.f32 %v382_v63, %v2013_v20 }
 0x292   :  { %v341_v11 = vpop.permute.xlu0 %340 }
 0x293   :  { %v345_v14 = vmul.f32 %v1624_v52, %v341_v11  ;;  %v2019_v25 = vadd.f32 %v377_v22, %v2011_v12  ;;  %v505_v52 = vmax.f32 %v504_v47, 0.0  ;;  %v1608_v22 = vld [vmem:[#allocation5 + $0x10] sm:$0xff]  }
 0x294   :  { %1513 = vmatmul.mubr.msk.bf16.gmra.mrb[8].mxu0 %vm121_vm0, %v1608_v22 }
 0x295   :  { %v2016_v23 = vmul.f32 %v2006_v1, %v345_v14  ;;  %v506_v57 = vmin.f32 %v505_v52, 1.0  ;;  %904 = vmatprep.mubr.bf16.mxu0 %v1842_v0 }
 0x297   :  { %v2023_v26 = vadd.f32 %v2013_v20, %v2016_v23  ;;  %v508_v60 = vsub.f32 1.0, %v506_v57 }
 0x299   :  { %v397_v27 = vpack.c.bf16 %v2023_v26, %v2019_v25 }
 0x29b   :  { %399 = vrot.lane.b32.xlu1 %v397_v27, %s1843_s1 }
 0x30d   :  { %v400_v28 = vpop.permute.xlu1 %399 }
 0x30e   :  { %1522 = vmatmul.mubr.msk.bf16.vlgmr.msra.gmra.mrb[8].mxu1 %vm248_vm1, %v400_v28 }
 0x30f   :  { %561 = vmatpush1.bf16.msra.mxu1 %v1940_v5  ;;  %592 = vmatprep.mubr.bf16.mxu1 %v1842_v0 }
 0x310   :  { %562 = vmatprep.subr.bf16.mxu1 %v1943_v7 }
 0x313   :  { %563 = vmatpush1.bf16.msra.mxu1 %v1948_v8 }
 0x314   :  { %716 = vmatprep.subr.bf16.mxu1 %v1938_v4 }
 0x3e1   :  { %v438_v30 = vpop.f32.mrb[8].mxu1 }
 0x3e2   :  { %v447_v31 = vadd.f32 %v438_v30, %v173_v29  ;;  %v440_v33 = vpop.f32.mrb[9].mxu1 }
 0x3e3   :  { %v441_v35 = vpop.f32.mrb[10].mxu1 }
 0x3e4   :  { %1629 = vtanh.f32 %v447_v31  ;;  %v442_v36 = vpop.f32.mrb[11].mxu1  ;;  %v1523_v40 = vmul.f32 -1.442695, %v447_v31 }
 0x3e5   :  { %v450_v37 = vadd.f32 %v442_v36, %v201_v34 }
 0x3e7   :  { %1631 = vtanh.f32 %v450_v37  ;;  %v1524_v41 = vmul.f32 -1.442695, %v450_v37 }
 0x3e8   :  { %1633 = vpow2.f32 %v1523_v40 }
 0x3e9   :  { %1635 = vpow2.f32 %v1524_v41 }
 0x3ee   :  { %v1630_v38 = vpop.eup %1629 }
 0x3ef   :  { %469 = vrot.lane.b32.xlu0 %v1630_v38, %s1839_s4 }
 0x3f1   :  { %v1632_v39 = vpop.eup %1631 }
 0x3f2   :  { %471 = vrot.lane.b32.xlu1 %v1632_v39, %s1839_s4  ;;  %v1634_v18 = vpop.eup %1633 }
 0x3f3   :  { %v1636_v42 = vpop.eup %1635  ;;  %v457_v43 = vadd.f32 1.0, %v1634_v18 }
 0x3f4   :  { %v458_v44 = vadd.f32 1.0, %v1636_v42 }
 0x3f5   :  { %1637 = vrcp.f32 %v457_v43 }
 0x3f6   :  { %1639 = vrcp.f32 %v458_v44  ;;  %v178_v44 = vpop.f32.mrb[4].mxu0 }
 0x3f7   :  { %v2094_v15 = vpop.f32.mrb[5].mxu0 }
 0x3ff   :  { %v1638_v49 = vpop.eup %1637 }
 0x400   :  { %v1640_v53 = vpop.eup %1639  ;;  %v465_v6 = vmul.f32 %v1638_v49, %v2048_v3 }
 0x401   :  { %v466_v14 = vmul.f32 %v1640_v53, %v2052_v10 }
 0x461   :  { %v470_v50 = vpop.permute.xlu0 %469 }
 0x462   :  { %v475_v51 = vmul.f32 %v1638_v49, %v470_v50  ;;  %v179_v50 = vadd.f32 %v178_v44, %v1979_v19 }
 0x464   :  { %479 = vrot.lane.b32.xlu0 %v475_v51, %s1843_s1  ;;  %v472_v54 = vpop.permute.xlu1 %471 }
 0x465   :  { %v476_v56 = vmul.f32 %v1640_v53, %v472_v54 }
 0x467   :  { %481 = vrot.lane.b32.xlu1 %v476_v56, %s1843_s1 }
 0x468   :  { %511 = vperm.xlu0 %1594, %v502_v55  }
 0x46b   :  { %516 = vperm.xlu1 %1595, %v506_v57  }
 0x46c   :  { %523 = vperm.xlu0 %1594, %v507_v59  }
 0x46f   :  { %528 = vperm.xlu1 %1595, %v508_v60  }
 0x4d6   :  { %v480_v9 = vpop.permute.xlu0 %479 }
 0x4d7   :  { %v2054_v11 = vadd.f32 %v480_v9, %v465_v6 }
 0x4d9   :  { %1641 = vtanh.f32 %v2054_v11  ;;  %v482_v27 = vpop.permute.xlu1 %481 }
 0x4da   :  { %v2058_v28 = vadd.f32 %v482_v27, %v466_v14 }
 0x4dc   :  { %1643 = vtanh.f32 %v2058_v28 }
 0x4e3   :  { %v1642_v61 = vpop.eup %1641 }
 0x4e4   :  { %491 = vrot.lane.b32.xlu0 %v1642_v61, %s1839_s4  ;;  %v1531_v61 = vadd.s32 4294967291, %v1990_v32 }
 0x4e6   :  { %v1644_v20 = vpop.eup %1643  ;;  %v660_v22 = vcvt.s32.f32 %v1531_v61 }
 0x4e7   :  { %493 = vrot.lane.b32.xlu1 %v1644_v20, %s1839_s4  ;;  %v2067_v29 = vpop.permute.xlu0 %511  ;;  %v656_v20 = vcvt.s32.f32 %v1530_v58 }
 0x4ea   :  { %v2069_v30 = vpop.permute.xlu1 %516 }
 0x4eb   :  { %v2071_v31 = vpop.permute.xlu0 %523 }
 0x4ec   :  { %v531_v39 = vmul.f32 %v2071_v31, %v2019_v25  ;;  %v2096_v25 = vpop.f32.mrb[6].mxu0 }
 0x4ee   :  { %v2073_v33 = vpop.permute.xlu1 %528 }
 0x4ef   :  { %v532_v40 = vmul.f32 %v2073_v33, %v2023_v26  ;;  %v2098_v26 = vpop.f32.mrb[7].mxu0 }
 0x4f0   :  { %v2100_v45 = vpop.f32.mrb[8].mxu0 }
 0x4f1   :  { %v2102_v46 = vpop.f32.mrb[9].mxu0 }
 0x4f2   :  { %v2104_v47 = vpop.f32.mrb[10].mxu0 }
 0x4f3   :  { %v194_v48 = vpop.f32.mrb[11].mxu0 }
 0x4f4   :  { %v195_v54 = vadd.f32 %v194_v48, %v1984_v24 }
 0x556   :  { %v492_v34 = vpop.permute.xlu0 %491 }
 0x557   :  { %v497_v35 = vmul.f32 %v1638_v49, %v492_v34  ;;  %v657_v34 = vmax.f32 %v656_v20, 0.0 }
 0x559   :  { %v494_v36 = vpop.permute.xlu1 %493  ;;  %v2076_v37 = vmul.f32 %v2067_v29, %v497_v35  ;;  %v658_v44 = vmin.f32 %v657_v34, 1.0 }
 0x55a   :  { %v498_v38 = vmul.f32 %v1640_v53, %v494_v36 }
 0x55b   :  { %v2086_v18 = vadd.f32 %v531_v39, %v2076_v37  ;;  %v661_v39 = vmax.f32 %v660_v22, 0.0 }
 0x55c   :  { %v2083_v41 = vmul.f32 %v2069_v30, %v498_v38 }
 0x55e   :  { %v2089_v42 = vadd.f32 %v532_v40, %v2083_v41 }
 0x560   :  { %v553_v43 = vpack.c.bf16 %v2089_v42, %v2086_v18 }
 0x562   :  { %555 = vrot.lane.b32.xlu0 %v553_v43, %s1843_s1 }
 0x5d4   :  { %v556_v49 = vpop.permute.xlu0 %555 }
 0x5d5   :  { %1527 = vmatmul.mubr.msk.bf16.vlgmr.msra.gmra.mrb[12].mxu1 %vm248_vm1, %v556_v49  ;;  %v662_v49 = vmin.f32 %v661_v39, 1.0 }
 0x5d6   :  { %717 = vmatpush1.bf16.msra.mxu1 %v1940_v5  ;;  %748 = vmatprep.mubr.bf16.mxu1 %v1842_v0 }
 0x5d7   :  { %718 = vmatprep.subr.bf16.mxu1 %v1943_v7 }
 0x5da   :  { %719 = vmatpush1.bf16.msra.mxu1 %v1948_v8 }
 0x5db   :  { %996 = vmatprep.subr.bf16.mxu1 %v1938_v4 }
 0x6a8   :  { %v594_v51 = vpop.f32.mrb[12].mxu1 }
 0x6a9   :  { %v603_v52 = vadd.f32 %v594_v51, %v179_v50  ;;  %v596_v53 = vpop.f32.mrb[13].mxu1  ;;  %v663_v50 = vsub.f32 1.0, %v658_v44  ;;  %v664_v51 = vsub.f32 1.0, %v662_v49 }
 0x6aa   :  { %v597_v55 = vpop.f32.mrb[14].mxu1  ;;  %v535_v53 = vmul.f32 %v2067_v29, %v2054_v11 }
 0x6ab   :  { %1645 = vtanh.f32 %v603_v52  ;;  %v598_v56 = vpop.f32.mrb[15].mxu1  ;;  %v1528_v62 = vmul.f32 -1.442695, %v603_v52  ;;  %v537_v52 = vmul.f32 %v2071_v31, %v2048_v3 }
 0x6ac   :  { %v606_v57 = vadd.f32 %v598_v56, %v195_v54  ;;  %v538_v54 = vmul.f32 %v2073_v33, %v2052_v10  ;;  %v536_v56 = vmul.f32 %v2069_v30, %v2058_v28 }
 0x6ad   :  { %v2126_v55 = vadd.f32 %v537_v52, %v535_v53 }
 0x6ae   :  { %1647 = vtanh.f32 %v606_v57  ;;  %v1529_v63 = vmul.f32 -1.442695, %v606_v57 }
 0x6af   :  { %1649 = vpow2.f32 %v1528_v62 }
 0x6b0   :  { %1651 = vpow2.f32 %v1529_v63 }
 0x6b5   :  { %v1646_v59 = vpop.eup %1645 }
 0x6b6   :  { %625 = vrot.lane.b32.xlu1 %v1646_v59, %s1839_s4 }
 0x6b8   :  { %v1648_v60 = vpop.eup %1647 }
 0x6b9   :  { %627 = vrot.lane.b32.xlu0 %v1648_v60, %s1839_s4  ;;  %v1650_v6 = vpop.eup %1649  ;;  %v2131_v60 = vadd.f32 %v538_v54, %v536_v56 }
 0x6ba   :  { %v1652_v9 = vpop.eup %1651  ;;  %v613_v14 = vadd.f32 1.0, %v1650_v6 }
 0x6bb   :  { %v614_v27 = vadd.f32 1.0, %v1652_v9 }
 0x6bc   :  { %1653 = vrcp.f32 %v613_v14 }
 0x6bd   :  { %1655 = vrcp.f32 %v614_v27 }
 0x6c6   :  { %v1654_v35 = vpop.eup %1653 }
 0x6c7   :  { %v1656_v40 = vpop.eup %1655  ;;  %v621_v57 = vmul.f32 %v1654_v35, %v2126_v55 }
 0x6c8   :  { %v622_v3 = vmul.f32 %v1656_v40, %v2131_v60 }
 0x728   :  { %v626_v36 = vpop.permute.xlu1 %625 }
 0x729   :  { %v631_v38 = vmul.f32 %v1654_v35, %v626_v36 }
 0x72b   :  { %635 = vrot.lane.b32.xlu1 %v631_v38, %s1843_s1  ;;  %v628_v43 = vpop.permute.xlu0 %627 }
 0x72c   :  { %v632_v48 = vmul.f32 %v1656_v40, %v628_v43 }
 0x72e   :  { %637 = vrot.lane.b32.xlu0 %v632_v48, %s1843_s1 }
 0x72f   :  { %667 = vperm.xlu1 %1595, %v658_v44  }
 0x732   :  { %672 = vperm.xlu0 %1594, %v662_v49  }
 0x733   :  { %679 = vperm.xlu1 %1595, %v663_v50   ;;  %v191_v50 = vadd.f32 %v2102_v46, %v1984_v24  ;;  %v1535_v46 = vadd.s32 4294967293, %v1990_v32 }
 0x736   :  { %684 = vperm.xlu0 %1594, %v664_v51  }
 0x79d   :  { %v636_v59 = vpop.permute.xlu1 %635 }
 0x79e   :  { %v2133_v62 = vadd.f32 %v636_v59, %v621_v57 }
 0x7a0   :  { %1657 = vtanh.f32 %v2133_v62  ;;  %v638_v11 = vpop.permute.xlu0 %637 }
 0x7a1   :  { %v2137_v63 = vadd.f32 %v638_v11, %v622_v3 }
 0x7a3   :  { %1659 = vtanh.f32 %v2137_v63 }
 0x7aa   :  { %v1658_v10 = vpop.eup %1657 }
 0x7ab   :  { %647 = vrot.lane.b32.xlu1 %v1658_v10, %s1839_s4  ;;  %v1536_v10 = vadd.s32 4294967292, %v1990_v32 }
 0x7ad   :  { %v1660_v28 = vpop.eup %1659 }
 0x7ae   :  { %649 = vrot.lane.b32.xlu0 %v1660_v28, %s1839_s4  ;;  %v2142_v6 = vpop.permute.xlu1 %667  ;;  %v812_v28 = vcvt.s32.f32 %v1535_v46 }
 0x7b1   :  { %v2144_v9 = vpop.permute.xlu0 %672 }
 0x7b2   :  { %v2146_v14 = vpop.permute.xlu1 %679 }
 0x7b3   :  { %v687_v36 = vmul.f32 %v2146_v14, %v2086_v18  ;;  %v183_v18 = vadd.f32 %v2096_v25, %v1979_v19 }
 0x7b5   :  { %v2148_v27 = vpop.permute.xlu0 %684 }
 0x7b6   :  { %v688_v38 = vmul.f32 %v2148_v27, %v2089_v42 }
 0x81d   :  { %v648_v58 = vpop.permute.xlu1 %647 }
 0x81e   :  { %v653_v61 = vmul.f32 %v1654_v35, %v648_v58  ;;  %v816_v58 = vcvt.s32.f32 %v1536_v10 }
 0x820   :  { %v650_v20 = vpop.permute.xlu0 %649  ;;  %v2151_v22 = vmul.f32 %v2142_v6, %v653_v61  ;;  %v813_v61 = vmax.f32 %v812_v28, 0.0 }
 0x821   :  { %v654_v34 = vmul.f32 %v1656_v40, %v650_v20 }
 0x822   :  { %v2161_v43 = vadd.f32 %v687_v36, %v2151_v22 }
 0x823   :  { %v2158_v39 = vmul.f32 %v2144_v9, %v654_v34 }
 0x825   :  { %v2164_v44 = vadd.f32 %v688_v38, %v2158_v39  ;;  %v817_v38 = vmax.f32 %v816_v58, 0.0 }
 0x827   :  { %v709_v35 = vpack.c.bf16 %v2164_v44, %v2161_v43 }
 0x829   :  { %711 = vrot.lane.b32.xlu1 %v709_v35, %s1843_s1 }
 0x89b   :  { %v712_v40 = vpop.permute.xlu1 %711 }
 0x89c   :  { %1532 = vmatmul.mubr.msk.bf16.vlgmr.msra.gmra.mrb[16].mxu1 %vm248_vm1, %v712_v40 }
 0x89d   :  { %997 = vmatpush1.bf16.msra.mxu1 %v1940_v5  ;;  %1028 = vmatprep.mubr.bf16.mxu1 %v1842_v0 }
 0x89e   :  { %998 = vmatprep.subr.bf16.mxu1 %v1943_v7 }
 0x8a1   :  { %999 = vmatpush1.bf16.msra.mxu1 %v1948_v8 }
 0x8a2   :  { %1244 = vmatprep.subr.bf16.mxu1 %v1938_v4 }
 0x96f   :  { %v750_v42 = vpop.f32.mrb[16].mxu1 }
 0x970   :  { %v759_v48 = vadd.f32 %v750_v42, %v183_v18  ;;  %v752_v49 = vpop.f32.mrb[17].mxu1  ;;  %v814_v18 = vmin.f32 %v813_v61, 1.0 }
 0x971   :  { %v753_v51 = vpop.f32.mrb[18].mxu1 }
 0x972   :  { %1661 = vtanh.f32 %v759_v48  ;;  %v754_v52 = vpop.f32.mrb[19].mxu1  ;;  %v1533_v4 = vmul.f32 -1.442695, %v759_v48  ;;  %v818_v48 = vmin.f32 %v817_v38, 1.0  ;;  %v819_v49 = vsub.f32 1.0, %v814_v18 }
 0x973   :  { %v762_v53 = vadd.f32 %v754_v52, %v191_v50  ;;  %v693_v50 = vmul.f32 %v2146_v14, %v2126_v55  ;;  %v691_v51 = vmul.f32 %v2142_v6, %v2133_v62  ;;  %v694_v52 = vmul.f32 %v2148_v27, %v2131_v60 }
 0x974   :  { %v820_v32 = vsub.f32 1.0, %v818_v48 }
 0x975   :  { %1663 = vtanh.f32 %v762_v53  ;;  %v1534_v57 = vmul.f32 -1.442695, %v762_v53  ;;  %v2191_v53 = vadd.f32 %v693_v50, %v691_v51  ;;  %v185_v50 = vadd.f32 %v2098_v26, %v1984_v24 }
 0x976   :  { %1665 = vpow2.f32 %v1533_v4 }
 0x977   :  { %1667 = vpow2.f32 %v1534_v57 }
 0x97c   :  { %v1662_v54 = vpop.eup %1661 }
 0x97d   :  { %781 = vrot.lane.b32.xlu0 %v1662_v54, %s1839_s4  ;;  %v692_v54 = vmul.f32 %v2144_v9, %v2137_v63 }
 0x97f   :  { %v1664_v56 = vpop.eup %1663  ;;  %v2196_v57 = vadd.f32 %v694_v52, %v692_v54 }
 0x980   :  { %783 = vrot.lane.b32.xlu1 %v1664_v56, %s1839_s4  ;;  %v1666_v25 = vpop.eup %1665 }
 0x981   :  { %v1668_v59 = vpop.eup %1667  ;;  %v769_v3 = vadd.f32 1.0, %v1666_v25 }
 0x982   :  { %v770_v11 = vadd.f32 1.0, %v1668_v59 }
 0x983   :  { %1669 = vrcp.f32 %v769_v3 }
 0x984   :  { %1671 = vrcp.f32 %v770_v11 }
 0x98d   :  { %v1670_v20 = vpop.eup %1669 }
 0x98e   :  { %v1672_v35 = vpop.eup %1671  ;;  %v777_v56 = vmul.f32 %v1670_v20, %v2191_v53 }
 0x98f   :  { %v778_v55 = vmul.f32 %v1672_v35, %v2196_v57 }
 0x9ef   :  { %v782_v34 = vpop.permute.xlu0 %781 }
 0x9f0   :  { %v787_v36 = vmul.f32 %v1670_v20, %v782_v34 }
 0x9f2   :  { %791 = vrot.lane.b32.xlu0 %v787_v36, %s1843_s1  ;;  %v784_v40 = vpop.permute.xlu1 %783 }
 0x9f3   :  { %v788_v42 = vmul.f32 %v1672_v35, %v784_v40 }
 0x9f5   :  { %793 = vrot.lane.b32.xlu1 %v788_v42, %s1843_s1 }
 0x9f6   :  { %823 = vperm.xlu0 %1594, %v814_v18  }
 0x9f9   :  { %828 = vperm.xlu1 %1595, %v818_v48  }
 0x9fa   :  { %835 = vperm.xlu0 %1594, %v819_v49  }
 0x9fd   :  { %840 = vperm.xlu1 %1595, %v820_v32  }
 0xa64   :  { %v792_v4 = vpop.permute.xlu0 %791 }
 0xa65   :  { %v2198_v25 = vadd.f32 %v792_v4, %v777_v56 }
 0xa67   :  { %1673 = vtanh.f32 %v2198_v25  ;;  %v794_v62 = vpop.permute.xlu1 %793 }
 0xa68   :  { %v2202_v59 = vadd.f32 %v794_v62, %v778_v55 }
 0xa6a   :  { %1675 = vtanh.f32 %v2202_v59 }
 0xa71   :  { %v1674_v60 = vpop.eup %1673 }
 0xa72   :  { %803 = vrot.lane.b32.xlu0 %v1674_v60, %s1839_s4 }
 0xa74   :  { %v1676_v63 = vpop.eup %1675 }
 0xa75   :  { %805 = vrot.lane.b32.xlu1 %v1676_v63, %s1839_s4  ;;  %v2207_v3 = vpop.permute.xlu0 %823 }
 0xa78   :  { %v2209_v11 = vpop.permute.xlu1 %828 }
 0xa79   :  { %v2211_v46 = vpop.permute.xlu0 %835 }
 0xa7a   :  { %v843_v38 = vmul.f32 %v2211_v46, %v2161_v43  ;;  %v189_v43 = vadd.f32 %v2100_v45, %v1979_v19 }
 0xa7c   :  { %v2213_v10 = vpop.permute.xlu1 %840 }
 0xa7d   :  { %v844_v40 = vmul.f32 %v2213_v10, %v2164_v44 }
 0xae4   :  { %v804_v28 = vpop.permute.xlu0 %803 }
 0xae5   :  { %v809_v58 = vmul.f32 %v1670_v20, %v804_v28 }
 0xae7   :  { %v806_v61 = vpop.permute.xlu1 %805  ;;  %v2216_v34 = vmul.f32 %v2207_v3, %v809_v58 }
 0xae8   :  { %v810_v36 = vmul.f32 %v1672_v35, %v806_v61 }
 0xae9   :  { %v2226_v42 = vadd.f32 %v843_v38, %v2216_v34 }
 0xaea   :  { %v2223_v18 = vmul.f32 %v2209_v11, %v810_v36 }
 0xaec   :  { %v2229_v48 = vadd.f32 %v844_v40, %v2223_v18 }
 0xaee   :  { %v865_v20 = vpack.c.bf16 %v2229_v48, %v2226_v42 }
 0xaf0   :  { %867 = vrot.lane.b32.xlu0 %v865_v20, %s1843_s1  ;;  %v849_v20 = vmul.f32 %v2211_v46, %v2191_v53 }
 0xb62   :  { %v868_v35 = vpop.permute.xlu0 %867 }
 0xb63   :  { %1537 = vmatmul.mubr.msk.bf16.vlgmr.msra.gmra.mrb[12].mxu0 %vm248_vm1, %v868_v35  ;;  %v847_v35 = vmul.f32 %v2207_v3, %v2198_v25 }
 0xb64   :  { %1121 = vmatpush1.bf16.msra.mxu0 %v1940_v5  ;;  %1152 = vmatprep.mubr.bf16.mxu0 %v1842_v0 }
 0xb65   :  { %1122 = vmatprep.subr.bf16.mxu0 %v1943_v7 }
 0xb68   :  { %1123 = vmatpush1.bf16.msra.mxu0 %v1948_v8 }
 0xc36   :  { %v906_v44 = vpop.f32.mrb[12].mxu0 }
 0xc37   :  { %v915_v49 = vadd.f32 %v906_v44, %v189_v43  ;;  %v908_v32 = vpop.f32.mrb[13].mxu0  ;;  %v850_v43 = vmul.f32 %v2213_v10, %v2196_v57  ;;  %v2253_v44 = vadd.f32 %v849_v20, %v847_v35  ;;  %v181_v20 = vadd.f32 %v2094_v15, %v1984_v24 }
 0xc38   :  { %v909_v51 = vpop.f32.mrb[14].mxu0 }
 0xc39   :  { %1677 = vtanh.f32 %v915_v49  ;;  %v910_v52 = vpop.f32.mrb[15].mxu0  ;;  %v1538_v55 = vmul.f32 -1.442695, %v915_v49  ;;  %v848_v49 = vmul.f32 %v2209_v11, %v2202_v59 }
 0xc3a   :  { %v918_v54 = vadd.f32 %v910_v52, %v185_v50 }
 0xc3b   :  { %v2258_v51 = vadd.f32 %v850_v43, %v848_v49 }
 0xc3c   :  { %1679 = vtanh.f32 %v918_v54  ;;  %v1539_v62 = vmul.f32 -1.442695, %v918_v54 }
 0xc3d   :  { %1681 = vpow2.f32 %v1538_v55 }
 0xc3e   :  { %1683 = vpow2.f32 %v1539_v62 }
 0xc43   :  { %v1678_v56 = vpop.eup %1677 }
 0xc44   :  { %937 = vrot.lane.b32.xlu1 %v1678_v56, %s1839_s4 }
 0xc46   :  { %v1680_v4 = vpop.eup %1679 }
 0xc47   :  { %939 = vrot.lane.b32.xlu0 %v1680_v4, %s1839_s4  ;;  %v1682_v45 = vpop.eup %1681 }
 0xc48   :  { %v1684_v60 = vpop.eup %1683  ;;  %v925_v63 = vadd.f32 1.0, %v1682_v45 }
 0xc49   :  { %v926_v28 = vadd.f32 1.0, %v1684_v60  ;;  %v969_v60 = vmul.f32 %v2226_v42, %v2213_v10  ;;  %v193_v42 = vadd.f32 %v2104_v47, %v1979_v19 }
 0xc4a   :  { %1685 = vrcp.f32 %v925_v63  ;;  %v970_v63 = vmul.f32 %v2229_v48, %v2211_v46 }
 0xc4b   :  { %1687 = vrcp.f32 %v926_v28 }
 0xc54   :  { %v1686_v26 = vpop.eup %1685 }
 0xc55   :  { %v1688_v36 = vpop.eup %1687  ;;  %v933_v32 = vmul.f32 %v1686_v26, %v2253_v44 }
 0xc56   :  { %v934_v54 = vmul.f32 %v1688_v36, %v2258_v51 }
 0xcb6   :  { %v938_v58 = vpop.permute.xlu1 %937 }
 0xcb7   :  { %v943_v61 = vmul.f32 %v1686_v26, %v938_v58 }
 0xcb9   :  { %947 = vrot.lane.b32.xlu1 %v943_v61, %s1843_s1  ;;  %v940_v38 = vpop.permute.xlu0 %939 }
 0xcba   :  { %v944_v40 = vmul.f32 %v1688_v36, %v940_v38 }
 0xcbc   :  { %949 = vrot.lane.b32.xlu0 %v944_v40, %s1843_s1 }
 0xd2b   :  { %v948_v50 = vpop.permute.xlu1 %947 }
 0xd2c   :  { %v953_v52 = vadd.f32 %v948_v50, %v933_v32 }
 0xd2e   :  { %1689 = vtanh.f32 %v953_v52  ;;  %v950_v53 = vpop.permute.xlu0 %949 }
 0xd2f   :  { %v954_v56 = vadd.f32 %v950_v53, %v934_v54 }
 0xd31   :  { %1691 = vtanh.f32 %v954_v56 }
 0xd38   :  { %v1690_v25 = vpop.eup %1689 }
 0xd39   :  { %959 = vrot.lane.b32.xlu1 %v1690_v25, %s1839_s4 }
 0xd3b   :  { %v1692_v57 = vpop.eup %1691 }
 0xd3c   :  { %961 = vrot.lane.b32.xlu0 %v1692_v57, %s1839_s4 }
 0xdab   :  { %v960_v4 = vpop.permute.xlu1 %959 }
 0xdac   :  { %v965_v59 = vmul.f32 %v1686_v26, %v960_v4 }
 0xdae   :  { %v962_v55 = vpop.permute.xlu0 %961  ;;  %v2264_v62 = vmul.f32 %v965_v59, %v2209_v11 }
 0xdaf   :  { %v966_v45 = vmul.f32 %v1688_v36, %v962_v55  ;;  %v973_v55 = vmul.f32 %v953_v52, %v2209_v11 }
 0xdb0   :  { %v2274_v58 = vadd.f32 %v969_v60, %v2264_v62  ;;  %v974_v60 = vmul.f32 %v954_v56, %v2207_v3 }
 0xdb1   :  { %v2271_v28 = vmul.f32 %v966_v45, %v2207_v3  ;;  %v975_v45 = vmul.f32 %v2253_v44, %v2213_v10 }
 0xdb2   :  { %v1093_v52 = vmul.f32 %v2274_v58, %v2148_v27 }
 0xdb3   :  { %v2277_v61 = vadd.f32 %v970_v63, %v2271_v28  ;;  %v977_v63 = vadd.f32 %v975_v45, %v973_v55 }
 0xdb5   :  { %v989_v26 = vpack.c.bf16 %v2277_v61, %v2274_v58  ;;  %v1094_v56 = vmul.f32 %v2277_v61, %v2146_v14  ;;  %v175_v61 = vadd.f32 %v1981_v21, %v1984_v24 }
 0xdb7   :  { %991 = vrot.lane.b32.xlu1 %v989_v26, %s1843_s1  ;;  %v976_v26 = vmul.f32 %v2258_v51, %v2211_v46 }
 0xe29   :  { %v992_v36 = vpop.permute.xlu1 %991 }
 0xe2a   :  { %1540 = vmatmul.mubr.msk.bf16.vlgmr.msra.gmra.mrb[20].mxu1 %vm248_vm1, %v992_v36 }
 0xe2b   :  { %1245 = vmatpush1.bf16.msra.mxu1 %v1940_v5  ;;  %1276 = vmatprep.mubr.bf16.mxu1 %v1842_v0 }
 0xe2c   :  { %1246 = vmatprep.subr.bf16.mxu1 %v1943_v7 }
 0xe2f   :  { %1247 = vmatpush1.bf16.msra.mxu1 %v1948_v8 }
 0xefd   :  { %v1030_v48 = vpop.f32.mrb[20].mxu1 }
 0xefe   :  { %v1039_v38 = vadd.f32 %v1030_v48, %v193_v42  ;;  %v1032_v40 = vpop.f32.mrb[21].mxu1  ;;  %v978_v48 = vadd.f32 %v976_v26, %v974_v60 }
 0xeff   :  { %v1033_v35 = vpop.f32.mrb[22].mxu1 }
 0xf00   :  { %1693 = vtanh.f32 %v1039_v38  ;;  %v1034_v43 = vpop.f32.mrb[23].mxu1  ;;  %v1541_v7 = vmul.f32 -1.442695, %v1039_v38 }
 0xf01   :  { %v1042_v49 = vadd.f32 %v1034_v43, %v181_v20 }
 0xf03   :  { %1695 = vtanh.f32 %v1042_v49  ;;  %v1542_v8 = vmul.f32 -1.442695, %v1042_v49 }
 0xf04   :  { %1697 = vpow2.f32 %v1541_v7 }
 0xf05   :  { %1699 = vpow2.f32 %v1542_v8 }
 0xf0a   :  { %v1694_v5 = vpop.eup %1693 }
 0xf0b   :  { %1061 = vrot.lane.b32.xlu0 %v1694_v5, %s1839_s4 }
 0xf0d   :  { %v1696_v0 = vpop.eup %1695 }
 0xf0e   :  { %1063 = vrot.lane.b32.xlu1 %v1696_v0, %s1839_s4  ;;  %v1698_v47 = vpop.eup %1697 }
 0xf0f   :  { %v1700_v32 = vpop.eup %1699  ;;  %v1049_v50 = vadd.f32 1.0, %v1698_v47  ;;  %v199_v47 = vadd.f32 %v1969_v13, %v1979_v19 }
 0xf10   :  { %v1050_v54 = vadd.f32 1.0, %v1700_v32 }
 0xf11   :  { %1701 = vrcp.f32 %v1049_v50 }
 0xf12   :  { %1703 = vrcp.f32 %v1050_v54 }
 0xf1b   :  { %v1702_v15 = vpop.eup %1701 }
 0xf1c   :  { %v1704_v57 = vpop.eup %1703  ;;  %v1057_v36 = vmul.f32 %v1702_v15, %v977_v63 }
 0xf1d   :  { %v1058_v40 = vmul.f32 %v1704_v57, %v978_v48 }
 0xf7d   :  { %v1062_v53 = vpop.permute.xlu0 %1061 }
 0xf7e   :  { %v1067_v25 = vmul.f32 %v1702_v15, %v1062_v53 }
 0xf80   :  { %1071 = vrot.lane.b32.xlu0 %v1067_v25, %s1843_s1  ;;  %v1064_v4 = vpop.permute.xlu1 %1063 }
 0xf81   :  { %v1068_v59 = vmul.f32 %v1704_v57, %v1064_v4 }
 0xf83   :  { %1073 = vrot.lane.b32.xlu1 %v1068_v59, %s1843_s1 }
 0xff2   :  { %v1072_v42 = vpop.permute.xlu0 %1071 }
 0xff3   :  { %v1077_v38 = vadd.f32 %v1072_v42, %v1057_v36 }
 0xff5   :  { %1705 = vtanh.f32 %v1077_v38  ;;  %v1074_v20 = vpop.permute.xlu1 %1073 }
 0xff6   :  { %v1078_v35 = vadd.f32 %v1074_v20, %v1058_v40 }
 0xff8   :  { %1707 = vtanh.f32 %v1078_v35 }
 0xfff   :  { %v1706_v43 = vpop.eup %1705 }
0x1000   :  { %1083 = vrot.lane.b32.xlu0 %v1706_v43, %s1839_s4  ;;  %v1097_v43 = vmul.f32 %v1077_v38, %v2144_v9 }
0x1002   :  { %v1708_v11 = vpop.eup %1707 }
0x1003   :  { %1085 = vrot.lane.b32.xlu1 %v1708_v11, %s1839_s4  ;;  %v1099_v11 = vmul.f32 %v977_v63, %v2148_v27 }
0x1072   :  { %v1084_v3 = vpop.permute.xlu0 %1083 }
0x1073   :  { %v1089_v10 = vmul.f32 %v1702_v15, %v1084_v3  ;;  %v1098_v3 = vmul.f32 %v1078_v35, %v2142_v6 }
0x1075   :  { %v1086_v44 = vpop.permute.xlu1 %1085  ;;  %v2304_v46 = vmul.f32 %v1089_v10, %v2144_v9  ;;  %v1101_v10 = vadd.f32 %v1099_v11, %v1097_v43 }
0x1076   :  { %v1090_v51 = vmul.f32 %v1704_v57, %v1086_v44  ;;  %v1100_v44 = vmul.f32 %v978_v48, %v2146_v14 }
0x1077   :  { %v1095_v5 = vadd.f32 %v1093_v52, %v2304_v46 }
0x1078   :  { %v2311_v49 = vmul.f32 %v1090_v51, %v2142_v6 }
0x1079   :  { %v1217_v38 = vmul.f32 %v1095_v5, %v2073_v33 }
0x107a   :  { %v1096_v0 = vadd.f32 %v1094_v56, %v2311_v49  ;;  %v1102_v56 = vadd.f32 %v1100_v44, %v1098_v3  ;;  %v1223_v44 = vmul.f32 %v1101_v10, %v2073_v33 }
0x107c   :  { %v1113_v7 = vpack.c.bf16 %v1096_v0, %v1095_v5  ;;  %v1218_v35 = vmul.f32 %v1096_v0, %v2071_v31  ;;  %v171_v5 = vadd.f32 %v1973_v16, %v1984_v24 }
0x107e   :  { %1115 = vrot.lane.b32.xlu0 %v1113_v7, %s1843_s1 }
0x10f0   :  { %v1116_v8 = vpop.permute.xlu0 %1115 }
0x10f1   :  { %1543 = vmatmul.mubr.msk.bf16.vlgmr.msra.gmra.mrb[16].mxu0 %vm248_vm1, %v1116_v8 }
0x11c4   :  { %v1154_v58 = vpop.f32.mrb[16].mxu0 }
0x11c5   :  { %v1163_v32 = vadd.f32 %v1154_v58, %v199_v47  ;;  %v1156_v50 = vpop.f32.mrb[17].mxu0 }
0x11c6   :  { %v1157_v54 = vpop.f32.mrb[18].mxu0 }
0x11c7   :  { %1709 = vtanh.f32 %v1163_v32  ;;  %v1158_v15 = vpop.f32.mrb[19].mxu0  ;;  %v1544_v4 = vmul.f32 -1.442695, %v1163_v32 }
0x11c8   :  { %v1166_v53 = vadd.f32 %v1158_v15, %v175_v61 }
0x11ca   :  { %1711 = vtanh.f32 %v1166_v53  ;;  %v1545_v59 = vmul.f32 -1.442695, %v1166_v53 }
0x11cb   :  { %1713 = vpow2.f32 %v1544_v4 }
0x11cc   :  { %1715 = vpow2.f32 %v1545_v59 }
0x11d1   :  { %v1710_v25 = vpop.eup %1709 }
0x11d2   :  { %1185 = vrot.lane.b32.xlu1 %v1710_v25, %s1839_s4  ;;  %v203_v25 = vadd.f32 %v1975_v17, %v1979_v19 }
0x11d4   :  { %v1712_v57 = vpop.eup %1711 }
0x11d5   :  { %1187 = vrot.lane.b32.xlu0 %v1712_v57, %s1839_s4  ;;  %v1714_v13 = vpop.eup %1713 }
0x11d6   :  { %v1716_v55 = vpop.eup %1715  ;;  %v1173_v45 = vadd.f32 1.0, %v1714_v13 }
0x11d7   :  { %v1174_v60 = vadd.f32 1.0, %v1716_v55 }
0x11d8   :  { %1717 = vrcp.f32 %v1173_v45 }
0x11d9   :  { %1719 = vrcp.f32 %v1174_v60 }
0x11e2   :  { %v1718_v21 = vpop.eup %1717 }
0x11e3   :  { %v1720_v42 = vpop.eup %1719  ;;  %v1181_v51 = vmul.f32 %v1718_v21, %v1101_v10 }
0x11e4   :  { %v1182_v8 = vmul.f32 %v1720_v42, %v1102_v56 }
0x1244   :  { %v1186_v26 = vpop.permute.xlu1 %1185 }
0x1245   :  { %v1191_v36 = vmul.f32 %v1718_v21, %v1186_v26 }
0x1247   :  { %1195 = vrot.lane.b32.xlu1 %v1191_v36, %s1843_s1  ;;  %v1188_v40 = vpop.permute.xlu0 %1187 }
0x1248   :  { %v1192_v20 = vmul.f32 %v1720_v42, %v1188_v40 }
0x124a   :  { %1197 = vrot.lane.b32.xlu0 %v1192_v20, %s1843_s1 }
0x12b9   :  { %v1196_v52 = vpop.permute.xlu1 %1195 }
0x12ba   :  { %v1201_v7 = vadd.f32 %v1196_v52, %v1181_v51 }
0x12bc   :  { %1721 = vtanh.f32 %v1201_v7  ;;  %v1198_v47 = vpop.permute.xlu0 %1197  ;;  %v1221_v3 = vmul.f32 %v1201_v7, %v2069_v30 }
0x12bd   :  { %v1202_v58 = vadd.f32 %v1198_v47, %v1182_v8  ;;  %v1224_v8 = vmul.f32 %v1102_v56, %v2071_v31  ;;  %v1610_v31 = vld [vmem:[#allocation10 + $0x8] sm:$0xff]  }
0x12be   :  { %v1225_v52 = vadd.f32 %v1223_v44, %v1221_v3 }
0x12bf   :  { %1723 = vtanh.f32 %v1202_v58  ;;  %v1222_v51 = vmul.f32 %v1202_v58, %v2067_v29 }
0x12c6   :  { %v1722_v32 = vpop.eup %1721 }
0x12c7   :  { %1207 = vrot.lane.b32.xlu1 %v1722_v32, %s1839_s4 }
0x12c9   :  { %v1724_v9 = vpop.eup %1723 }
0x12ca   :  { %1209 = vrot.lane.b32.xlu0 %v1724_v9, %s1839_s4  ;;  %v1226_v9 = vadd.f32 %v1224_v8, %v1222_v51 }
0x1339   :  { %v1208_v27 = vpop.permute.xlu1 %1207 }
0x133a   :  { %v1213_v6 = vmul.f32 %v1718_v21, %v1208_v27 }
0x133c   :  { %v1210_v63 = vpop.permute.xlu0 %1209  ;;  %v2332_v14 = vmul.f32 %v1213_v6, %v2069_v30 }
0x133d   :  { %v1214_v48 = vmul.f32 %v1720_v42, %v1210_v63 }
0x133e   :  { %v1219_v61 = vadd.f32 %v1217_v38, %v2332_v14 }
0x133f   :  { %v1216_v50 = vmul.f32 %v1214_v48, %v2067_v29  ;;  %v1609_v29 = vld [vmem:[#allocation10] sm:$0xff]  }
0x1340   :  { %1566 = vmatprep.subr.bf16.mxu0 %v1609_v29 }
0x1341   :  { %v1220_v54 = vadd.f32 %v1218_v35, %v1216_v50  ;;  %1567 = vmatpush3.bf16.msra.mxu0 %v1609_v29 }
0x1342   :  { %1568 = vmatprep.subr.bf16.mxu0 %v1610_v31 }
0x1343   :  { %v1237_v15 = vpack.c.bf16 %v1220_v54, %v1219_v61 }
0x1345   :  { %1239 = vrot.lane.b32.xlu1 %v1237_v15, %s1843_s1  ;;  %1569 = vmatpush3.bf16.msra.mxu0 %v1610_v31 }
0x13b7   :  { %v1240_v53 = vpop.permute.xlu1 %1239 }
0x13b8   :  { %1546 = vmatmul.mubr.msk.bf16.vlgmr.msra.gmra.mrb[24].mxu1 %vm248_vm1, %v1240_v53 }
0x148b   :  { %v1278_v57 = vpop.f32.mrb[24].mxu1 }
0x148c   :  { %v1287_v4 = vadd.f32 %v1278_v57, %v203_v25  ;;  %v1280_v59 = vpop.f32.mrb[25].mxu1 }
0x148d   :  { %v1281_v0 = vpop.f32.mrb[26].mxu1 }
0x148e   :  { %1725 = vtanh.f32 %v1287_v4  ;;  %v1282_v13 = vpop.f32.mrb[27].mxu1  ;;  %v1547_v21 = vmul.f32 -1.442695, %v1287_v4 }
0x148f   :  { %v1289_v55 = vadd.f32 %v1282_v13, %v171_v5 }
0x1491   :  { %1727 = vtanh.f32 %v1289_v55  ;;  %v1548_v26 = vmul.f32 -1.442695, %v1289_v55 }
0x1492   :  { %1729 = vpow2.f32 %v1547_v21  ;;  %v1549_v21 = vld [vmem:[%s2434_s6] ss:$0 sm:$0xff] }
0x1493   :  { %1731 = vpow2.f32 %v1548_v26 }
0x1498   :  { %v1726_v45 = vpop.eup %1725 }
0x1499   :  { %1308 = vrot.lane.b32.xlu1 %v1726_v45, %s1839_s4 }
0x149b   :  { %v1728_v60 = vpop.eup %1727 }
0x149c   :  { %1310 = vrot.lane.b32.xlu0 %v1728_v60, %s1839_s4  ;;  %v1730_v17 = vpop.eup %1729 }
0x149d   :  { %v1732_v19 = vpop.eup %1731  ;;  %v1296_v36 = vadd.f32 1.0, %v1730_v17 }
0x149e   :  { %v1297_v42 = vadd.f32 1.0, %v1732_v19 }
0x149f   :  { %1733 = vrcp.f32 %v1296_v36 }
0x14a0   :  { %1735 = vrcp.f32 %v1297_v42 }
0x14a9   :  { %v2346_v16 = vpop.eup %1733 }
0x14aa   :  { %v1736_v20 = vpop.eup %1735  ;;  %v1304_v47 = vmul.f32 %v2346_v16, %v1225_v52 }
0x14ab   :  { %v1305_v6 = vmul.f32 %v1736_v20, %v1226_v9 }
0x150b   :  { %v1309_v24 = vpop.permute.xlu1 %1308 }
0x150c   :  { %v1314_v40 = vmul.f32 %v2346_v16, %v1309_v24 }
0x150e   :  { %1318 = vrot.lane.b32.xlu1 %v1314_v40, %s1843_s1  ;;  %v1311_v43 = vpop.permute.xlu0 %1310 }
0x150f   :  { %v1315_v11 = vmul.f32 %v1736_v20, %v1311_v43 }
0x1511   :  { %1320 = vrot.lane.b32.xlu0 %v1315_v11, %s1843_s1 }
0x1580   :  { %v1319_v32 = vpop.permute.xlu1 %1318 }
0x1581   :  { %v1324_v27 = vadd.f32 %v1319_v32, %v1304_v47 }
0x1583   :  { %1737 = vtanh.f32 %v1324_v27  ;;  %v1321_v63 = vpop.permute.xlu0 %1320 }
0x1584   :  { %v1325_v48 = vadd.f32 %v1321_v63, %v1305_v6 }
0x1586   :  { %1739 = vtanh.f32 %v1325_v48 }
0x158d   :  { %v1738_v38 = vpop.eup %1737 }
0x158e   :  { %1330 = vrot.lane.b32.xlu1 %v1738_v38, %s1839_s4 }
0x1590   :  { %v1740_v30 = vpop.eup %1739 }
0x1591   :  { %1332 = vrot.lane.b32.xlu0 %v1740_v30, %s1839_s4 }
0x1592   :  { %542 = vrot.lane.b32.xlu1 %v2076_v37, %s1843_s1  ;;  %v1612_v37 = vld [vmem:[#allocation10 + $0x18] sm:$0xff]  }
0x1595   :  { %386 = vrot.lane.b32.xlu0 %v2011_v12, %s1843_s1  ;;  %v1611_v12 = vld [vmem:[#allocation10 + $0x10] sm:$0xff]  }
0x1596   :  { %854 = vrot.lane.b32.xlu1 %v2216_v34, %s1843_s1  ;;  %1570 = vmatprep.subr.bf16.mxu0 %v1611_v12 }
0x1597   :  { %1571 = vmatpush3.bf16.msra.mxu0 %v1611_v12 }
0x1598   :  { %1572 = vmatprep.subr.bf16.mxu0 %v1612_v37 }
0x1599   :  { %698 = vrot.lane.b32.xlu0 %v2151_v22, %s1843_s1 }
0x159a   :  { %1109 = vrot.lane.b32.xlu1 %v2311_v49, %s1839_s4 }
0x159b   :  { %1573 = vmatpush3.bf16.msra.mxu0 %v1612_v37 }
0x159d   :  { %1233 = vrot.lane.b32.xlu0 %v1216_v50, %s1839_s4 }
0x159e   :  { %860 = vrot.lane.b32.xlu1 %v2223_v18, %s1839_s4 }
0x15a1   :  { %985 = vrot.lane.b32.xlu0 %v2271_v28, %s1839_s4 }
0x15a5   :  { %704 = vrot.lane.b32.xlu0 %v2158_v39, %s1839_s4 }
0x15a9   :  { %391 = vrot.lane.b32.xlu0 %v2016_v23, %s1839_s4 }
0x15ad   :  { %980 = vrot.lane.b32.xlu0 %v2264_v62, %s1843_s1 }
0x15b1   :  { %1228 = vrot.lane.b32.xlu0 %v2332_v14, %s1843_s1 }
0x1600   :  { %v1331_v33 = vpop.permute.xlu1 %1330 }
0x1603   :  { %v1333_v22 = vpop.permute.xlu0 %1332 }
0x1604   :  { %v1337_v39 = vmul.f32 %v1736_v20, %v1333_v22  ;;  %v543_v34 = vpop.permute.xlu1 %542 }
0x1605   :  { %546 = vst.msk [vmem:[#allocation4 + $0x8] sm:$0xff] %vm248_vm1, %v543_v34 }
0x1606   :  { %v1339_v23 = vmul.f32 %v1337_v39, %v2008_v2  ;;  %v1336_v2 = vmul.f32 %v2346_v16, %v1331_v33 }
0x1607   :  { %v387_v18 = vpop.permute.xlu0 %386 }
0x1608   :  { %389 = vst.msk [vmem:[#allocation4] sm:$0xff] %vm248_vm1, %v387_v18  ;;  %v855_v62 = vpop.permute.xlu1 %854  ;;  %1346 = vrot.lane.b32.xlu1 %v1339_v23, %s1839_s4  ;;  %v1338_v7 = vmul.f32 %v1336_v2, %v2006_v1 }
0x1609   :  { %858 = vst.msk [vmem:[#allocation4 + $0x18] sm:$0xff] %vm248_vm1, %v855_v62 }
0x160b   :  { %v699_v28 = vpop.permute.xlu0 %698 }
0x160c   :  { %702 = vst.msk [vmem:[#allocation4 + $0x10] sm:$0xff] %vm248_vm1, %v699_v28  ;;  %v1110_v49 = vpop.permute.xlu1 %1109  ;;  %548 = vrot.lane.b32.xlu1 %v2083_v41, %s1839_s4  ;;  %s1844_s4 = smov [#allocation11]  }
0x160d   :  { %1112 = vst.msk [vmem:[#allocation4 + $0x10] sm:$0xff] %vm395_vm2, %v1110_v49  ;;  %s1492_s25 = sshll.u32 %s1844_s4, 4  ;;  %s1493_s25 = int_to_ptr.vmem [resolvable:$true] %s1492_s25 }
0x160e   :  { %s1807_s6 = scalar_lea.vmem %s1493_s25, 1024  ;;  %p1812_p11 = scmp.lt.s32.totalorder %s1493_s25, %s1493_s25 }
0x160f   :  { %v1234_v10 = vpop.permute.xlu0 %1233  ;;  %p1808_p10 = scmp.ne.s32.totalorder %s1493_s25, %s1807_s6  ;;  %p1813_p12 = scmp.lt.s32.totalorder %s1807_s6, %s1807_s6 }
0x1610   :  { %1236 = vst.msk [vmem:[#allocation4 + $0x8] sm:$0xff] %vm395_vm2, %v1234_v10  ;;  %v861_v56 = vpop.permute.xlu1 %860  ;;  %1104 = vrot.lane.b32.xlu1 %v2304_v46, %s1843_s1 }
0x1611   :  { %864 = vst.msk [vmem:[#allocation4 + $0x20] sm:$0xff] %vm395_vm2, %v861_v56  ;;  %p1814_p13 = por %p1813_p12, %p1812_p11 }
0x1613   :  { %v986_v58 = vpop.permute.xlu0 %985  ;;  %p1815_p0 = pnand %p1814_p13, %p1808_p10 }
0x1614   :  { %988 = vst.msk [vmem:[#allocation4 + $0x18] sm:$0xff] %vm395_vm2, %v986_v58  ;;  %1341 = vrot.lane.b32.xlu1 %v1338_v7, %s1843_s1  ;;  %v1352_v57 = vld [vmem:[#allocation4 + $0x10] sm:$0xff] }
0x1617   :  { %v705_v41 = vpop.permute.xlu0 %704  ;;  %v1351_v53 = vld [vmem:[#allocation4 + $0x8] sm:$0xff] }
0x1618   :  { %708 = vst.msk [vmem:[#allocation4 + $0x28] sm:$0xff] %vm395_vm2, %v705_v41 }
0x161b   :  { %v392_v14 = vpop.permute.xlu0 %391  ;;  %v1353_v1 = vld [vmem:[#allocation4 + $0x18] sm:$0xff] }
0x161c   :  { %396 = vst.msk [vmem:[#allocation4 + $0x38] sm:$0xff] %vm395_vm2, %v392_v14  ;;  %v1359_v4 = vpack.c.bf16 %v1353_v1, %v1352_v57 }
0x161f   :  { %v981_v35 = vpop.permute.xlu0 %980 }
0x1620   :  { %983 = vst.msk [vmem:[#allocation4 + $0x20] sm:$0xff] %vm248_vm1, %v981_v35 }
0x1623   :  { %v1229_v61 = vpop.permute.xlu0 %1228 }
0x1627   :  { %v1354_v5 = vld [vmem:[#allocation4 + $0x20] sm:$0xff] }
0x167a   :  { %v1347_v50 = vpop.permute.xlu1 %1346 }
0x167b   :  { %1349 = vst.msk [vmem:[#allocation4] sm:$0xff] %vm395_vm2, %v1347_v50 }
0x167e   :  { %v549_v46 = vpop.permute.xlu1 %548 }
0x167f   :  { %552 = vst.msk [vmem:[#allocation4 + $0x30] sm:$0xff] %vm395_vm2, %v549_v46 }
0x1680   :  { %1231 = vst.msk [vmem:[#allocation4 + $0x30] sm:$0xff] %vm248_vm1, %v1229_v61 }
0x1682   :  { %v1105_v54 = vpop.permute.xlu1 %1104  ;;  %v1350_v15 = vld [vmem:[#allocation4] sm:$0xff] }
0x1683   :  { %1107 = vst.msk [vmem:[#allocation4 + $0x28] sm:$0xff] %vm248_vm1, %v1105_v54  ;;  %v1358_v25 = vpack.c.bf16 %v1351_v53, %v1350_v15 }
0x1685   :  { %1574 = vmatprep.mubr.msk.bf16.mxu0 %vm1401_vm3, %v1358_v25 }
0x1686   :  { %v1342_v59 = vpop.permute.xlu1 %1341  ;;  %1575 = vmatmul.mubr.msk.bf16.vlgmr.msra.gmra.mrb[20].mxu0 %vm1401_vm3, %v1359_v4 }
0x1687   :  { %1344 = vst.msk [vmem:[#allocation4 + $0x38] sm:$0xff] %vm248_vm1, %v1342_v59  ;;  %v1356_v55 = vld [vmem:[#allocation4 + $0x30] sm:$0xff] }
0x168a   :  { %v1355_v0 = vld [vmem:[#allocation4 + $0x28] sm:$0xff] }
0x168b   :  { %v1360_v13 = vpack.c.bf16 %v1355_v0, %v1354_v5 }
0x168d   :  { %1578 = vmatprep.mubr.msk.bf16.mxu0 %vm1401_vm3, %v1360_v13 }
0x168e   :  { %v1357_v45 = vld [vmem:[#allocation4 + $0x38] sm:$0xff] }
0x168f   :  { %v1361_v60 = vpack.c.bf16 %v1357_v45, %v1356_v55 }
0x1691   :  { %1579 = vmatmul.mubr.msk.bf16.gmra.mrb[24].mxu0 %vm1401_vm3, %v1361_v60 }
0x1759   :  { %v1576_v26 = vpop.f32.mrb[20].mxu0 }
0x175a   :  { %v1457_v17 = vadd.f32 %v1576_v26, %v1549_v21  ;;  %v1448_v19 = vpop.f32.mrb[21].mxu0 }
0x175b   :  { %v1449_v36 = vadd.f32 %v1549_v21, %v1448_v19  ;;  %v1577_v42 = vpop.f32.mrb[22].mxu0 }
0x175c   :  { %1481 = vst [vmem:[#allocation11 + $0x10] sm:$0xff] %v1457_v17  ;;  %v1460_v16 = vadd.f32 %v1577_v42, %v1549_v21  ;;  %v1451_v24 = vpop.f32.mrb[23].mxu0 }
0x175d   :  { %1479 = vst [vmem:[#allocation11] sm:$0xff] %v1449_v36  ;;  %v1452_v40 = vadd.f32 %v1549_v21, %v1451_v24 }
0x175e   :  { %1482 = vst [vmem:[#allocation11 + $0x18] sm:$0xff] %v1460_v16 }
0x175f   :  { %1480 = vst [vmem:[#allocation11 + $0x8] sm:$0xff] %v1452_v40 }
0x1764   :  { %v1580_v20 = vpop.f32.mrb[24].mxu0 }
0x1765   :  { %v1473_v43 = vadd.f32 %v1580_v20, %v1549_v21  ;;  %v1464_v11 = vpop.f32.mrb[25].mxu0 }
0x1766   :  { %v1465_v3 = vadd.f32 %v1549_v21, %v1464_v11  ;;  %v1581_v44 = vpop.f32.mrb[26].mxu0 }
0x1767   :  { %1485 = vst [vmem:[#allocation11 + $0x30] sm:$0xff] %v1473_v43  ;;  %v1476_v51 = vadd.f32 %v1581_v44, %v1549_v21  ;;  %v1467_v52 = vpop.f32.mrb[27].mxu0 }
0x1768   :  { %1483 = vst [vmem:[#allocation11 + $0x20] sm:$0xff] %v1465_v3  ;;  %v1468_v8 = vadd.f32 %v1549_v21, %v1467_v52 }
0x1769   :  { %1486 = vst [vmem:[#allocation11 + $0x38] sm:$0xff] %v1476_v51 }
0x176a   :  { %1484 = vst [vmem:[#allocation11 + $0x28] sm:$0xff] %v1468_v8 }
0x176b   :  { %1818 = shalt.err (!%p1815_p0)
}
0x176c   :  { %s1819_s28 = scalar_lea.hbm %s2435_s7, 1024 }
0x176d   :  { %p1820_p1 = scmp.ne.s32.totalorder %s2435_s7, %s1819_s28  ;;  %p1823_p2 = scmp.lt.u32.totalorder %s1819_s28, %s2435_s7 }
0x176f   :  { %p1825_p3 = pnand %p1823_p2, %p1820_p1 }
0x1771   :  { %1828 = shalt.err (!%p1825_p3)
}
0x1772   :  { %1498 = dma.vmem_to_hbm [thread:$0]  %s1493_s25, 1024, %s2435_s7, [#allocation7], %s1836_s11, %s1836_s11, %s1837_s12  }
0x1773   :  { %1833 = dma.done.wait [#allocation7], 1024  }
0x1774   :  { %1834 = vsyncadd [#allocation7], 4294966272 }
0x1775   :  { %1502 = vsyncpa [#allocation6], 1 }
0x1776   :  { %1503 = vsyncpa [#allocation9], 1 }
0x1777   :  { %1504 = vsyncpa [#allocation7], 1 }

</bundles_post_ra>
